<compile_context>
chip_gen: v5e
topology: v5e:2x2
jax: 0.10.0
libtpu: 0.0.40
codegen_flags: <defaults>
</compile_context>

<pallas_src>
import math
import functools

import jax
import jax.numpy as jnp
from jax.experimental import pallas as pl
from jax.experimental.pallas import tpu as pltpu

# Matmul operand dtype. Default float32 preserves the exact reference numerics.
# On v6e/v7x set to jnp.bfloat16 for ~2x MXU throughput (accumulation stays f32
# via preferred_element_type); on v5e keep float32.
_MXU_DTYPE = jnp.float32

_ROW_TILE = 256        # M (=B*S) row tile for dense kernels
_LN_EPS = 1e-6


def _mxu(x):
    return x.astype(_MXU_DTYPE)


def _layernorm(y, gamma, beta, eps):
    # torch semantics: unbiased std (ddof=1), eps added to std (not var).
    e = y.shape[-1]
    mean = jnp.mean(y, axis=-1, keepdims=True)
    diff = y - mean
    var = jnp.sum(diff * diff, axis=-1, keepdims=True) * (1.0 / (e - 1))
    std = jnp.sqrt(var)
    return gamma * diff / (std + eps) + beta


# ----------------------------- Pallas kernels ------------------------------

def _linear_kernel(x_ref, w_ref, b_ref, o_ref):
    # x: (TM, K), w: (K, N), b: (1, N)
    o_ref[...] = (
        jnp.dot(_mxu(x_ref[...]), _mxu(w_ref[...]),
                preferred_element_type=jnp.float32) + b_ref[...]
    ).astype(o_ref.dtype)


def _ffn_res_ln_kernel(x_ref, w1_ref, b1_ref, w2_ref, b2_ref,
                       g_ref, bt_ref, o_ref, *, eps):
    # Linear -> ReLU -> (Dropout=id) -> Linear -> +residual(x) -> LayerNorm, fused.
    x = x_ref[...]
    h = jnp.dot(_mxu(x), _mxu(w1_ref[...]),
                preferred_element_type=jnp.float32) + b1_ref[...]
    h = jnp.maximum(h, 0.0)
    ff = jnp.dot(_mxu(h), _mxu(w2_ref[...]),
                 preferred_element_type=jnp.float32) + b2_ref[...]
    y = ff + x
    o_ref[...] = _layernorm(y, g_ref[...], bt_ref[...], eps).astype(o_ref.dtype)


def _mha_core_kernel(q_ref, k_ref, v_ref, mask_ref, wo_ref, bo_ref,
                     res_ref, g_ref, bt_ref, o_ref, *, scale, eps):
    # Per-batch tile, all heads batched:
    #   scores -> mask -> softmax -> ctx -> output projection -> +residual -> LN.
    q = q_ref[0]          # (H, Sq, dk)
    k = k_ref[0]          # (H, Sk, dk)
    v = v_ref[0]          # (H, Sk, dk)

    # (H, Sq, Sk), contraction on the last dims -> no transpose of K materialized.
    s = jnp.einsum("hqd,hkd->hqk", _mxu(q), _mxu(k),
                   preferred_element_type=jnp.float32) * scale
    s = jnp.where(mask_ref[...] == 0.0, jnp.float32(-1e10), s)   # mask (1,Sq,Sk) bcast over H
    s = s - jnp.max(s, axis=-1, keepdims=True)
    p = jnp.exp(s)
    p = p * pl.reciprocal(jnp.sum(p, axis=-1, keepdims=True), approx=True)

    ctx = jnp.einsum("hqk,hkd->hqd", _mxu(p), _mxu(v),
                     preferred_element_type=jnp.float32)          # (H, Sq, dk)

    # Fused output projection: wo reshaped to (H, dk, E); sum over heads gives a
    # lane-dense (Sq, E) result — no per-head sub-128 stores, no XLA transpose after.
    proj = jnp.einsum("hqd,hde->hqe", _mxu(ctx), _mxu(wo_ref[...]),
                      preferred_element_type=jnp.float32)         # (H, Sq, E)
    y = jnp.sum(proj, axis=0) + bo_ref[...] + res_ref[0]          # (Sq, E)

    o_ref[0] = _layernorm(y, g_ref[...], bt_ref[...], eps).astype(o_ref.dtype)


# ------------------------------ wrappers ------------------------------------

def linear(x2d, w, b, *, row_tile=_ROW_TILE):
    # x: (M, K), w: (K, N), b: (N,). Tiled over M; weights pinned via constant index_map.
    M, K = x2d.shape
    N = w.shape[1]
    tm = M if M <= row_tile else row_tile
    return pl.pallas_call(
        _linear_kernel,
        out_shape=jax.ShapeDtypeStruct((M, N), jnp.float32),
        grid=(pl.cdiv(M, tm),),
        in_specs=[
            pl.BlockSpec((tm, K), lambda i: (i, 0)),
            pl.BlockSpec((K, N), lambda i: (0, 0)),
            pl.BlockSpec((1, N), lambda i: (0, 0)),
        ],
        out_specs=pl.BlockSpec((tm, N), lambda i: (i, 0)),
        compiler_params=pltpu.CompilerParams(dimension_semantics=("parallel",)),
    )(x2d, w, b.reshape(1, N))


def feed_forward_residual_ln(x2d, w1, b1, w2, b2, gamma, beta,
                             *, eps=_LN_EPS, row_tile=_ROW_TILE):
    M, E = x2d.shape
    inner = w1.shape[1]
    tm = M if M <= row_tile else row_tile
    return pl.pallas_call(
        functools.partial(_ffn_res_ln_kernel, eps=eps),
        out_shape=jax.ShapeDtypeStruct((M, E), jnp.float32),
        grid=(pl.cdiv(M, tm),),
        in_specs=[
            pl.BlockSpec((tm, E), lambda i: (i, 0)),
            pl.BlockSpec((E, inner), lambda i: (0, 0)),
            pl.BlockSpec((1, inner), lambda i: (0, 0)),
            pl.BlockSpec((inner, E), lambda i: (0, 0)),
            pl.BlockSpec((1, E), lambda i: (0, 0)),
            pl.BlockSpec((1, E), lambda i: (0, 0)),
            pl.BlockSpec((1, E), lambda i: (0, 0)),
        ],
        out_specs=pl.BlockSpec((tm, E), lambda i: (i, 0)),
        compiler_params=pltpu.CompilerParams(dimension_semantics=("parallel",)),
    )(x2d, w1, b1.reshape(1, inner), w2, b2.reshape(1, E),
      gamma.reshape(1, E), beta.reshape(1, E))


def attention_proj_residual_ln(q, k, v, mask, wo, bo, residual, gamma, beta,
                               *, dk, eps=_LN_EPS):
    # q: (B, H, Sq, dk), k/v: (B, H, Sk, dk), mask: (B, Sq, Sk),
    # wo: (E, E) -> reshaped (H, dk, E), residual: (B, Sq, E).
    B, H, Sq, DK = q.shape
    Sk = k.shape[2]
    E = H * DK
    wo_r = wo.reshape(H, DK, E)
    return pl.pallas_call(
        functools.partial(_mha_core_kernel, scale=1.0 / math.sqrt(dk), eps=eps),
        out_shape=jax.ShapeDtypeStruct((B, Sq, E), jnp.float32),
        grid=(B,),
        in_specs=[
            pl.BlockSpec((1, H, Sq, DK), lambda b: (b, 0, 0, 0)),
            pl.BlockSpec((1, H, Sk, DK), lambda b: (b, 0, 0, 0)),
            pl.BlockSpec((1, H, Sk, DK), lambda b: (b, 0, 0, 0)),
            pl.BlockSpec((1, Sq, Sk), lambda b: (b, 0, 0)),
            pl.BlockSpec((H, DK, E), lambda b: (0, 0, 0)),
            pl.BlockSpec((1, E), lambda b: (0, 0)),
            pl.BlockSpec((1, Sq, E), lambda b: (b, 0, 0)),
            pl.BlockSpec((1, E), lambda b: (0, 0)),
            pl.BlockSpec((1, E), lambda b: (0, 0)),
        ],
        out_specs=pl.BlockSpec((1, Sq, E), lambda b: (b, 0, 0)),
        compiler_params=pltpu.CompilerParams(dimension_semantics=("parallel",)),
    )(q, k, v, mask, wo_r, bo.reshape(1, E), residual,
      gamma.reshape(1, E), beta.reshape(1, E))


def multi_head_attention_block(p, q_src, kv_src, mask, heads,
                               residual, gamma, beta, *, self_attn):
    B, Sq, E = q_src.shape
    Sk = kv_src.shape[1]
    dk = E // heads

    if self_attn:
        # Single fused (E, 3E) projection for Q, K, V.
        qkv = linear(q_src.reshape(B * Sq, E), p["w_qkv"], p["b_qkv"])
        qkv = qkv.reshape(B, Sq, 3, heads, dk)
        q = qkv[:, :, 0].transpose(0, 2, 1, 3)
        k = qkv[:, :, 1].transpose(0, 2, 1, 3)
        v = qkv[:, :, 2].transpose(0, 2, 1, 3)
    else:
        # Cross attention: Q from q_src, fused (E, 2E) K|V projection from kv_src.
        q = linear(q_src.reshape(B * Sq, E), p["w_qkv"][:, :E], p["b_qkv"][:E])
        q = q.reshape(B, Sq, heads, dk).transpose(0, 2, 1, 3)
        kv = linear(kv_src.reshape(B * Sk, E), p["w_qkv"][:, E:], p["b_qkv"][E:])
        kv = kv.reshape(B, Sk, 2, heads, dk)
        k = kv[:, :, 0].transpose(0, 2, 1, 3)
        v = kv[:, :, 1].transpose(0, 2, 1, 3)

    return attention_proj_residual_ln(q, k, v, mask, p["wo"], p["bo"],
                                      residual, gamma, beta, dk=dk)


def decoder_layer(params, encoder_out, target, x_mask, target_mask, heads):
    # dropout1/2/3 are identity (inference).
    out = multi_head_attention_block(
        params["mha1"], target, target, target_mask, heads,
        residual=target, gamma=params["ln1_gamma"], beta=params["ln1_beta"],
        self_attn=True)
    out = multi_head_attention_block(
        params["mha2"], out, encoder_out, x_mask, heads,
        residual=out, gamma=params["ln2_gamma"], beta=params["ln2_beta"],
        self_attn=False)
    B, S, E = out.shape
    out = feed_forward_residual_ln(
        out.reshape(B * S, E),
        params["ff_w1"], params["ff_b1"], params["ff_w2"], params["ff_b2"],
        params["ln3_gamma"], params["ln3_beta"]).reshape(B, S, E)
    return out


# ------------------------------ params --------------------------------------

def make_mha_params(key, E):
    ks = jax.random.split(key, 8)
    s = 0.02
    wq = s * jax.random.normal(ks[0], (E, E), jnp.float32)
    bq = s * jax.random.normal(ks[1], (E,), jnp.float32)
    wk = s * jax.random.normal(ks[2], (E, E), jnp.float32)
    bk = s * jax.random.normal(ks[3], (E,), jnp.float32)
    wv = s * jax.random.normal(ks[4], (E, E), jnp.float32)
    bv = s * jax.random.normal(ks[5], (E,), jnp.float32)
    wo = s * jax.random.normal(ks[6], (E, E), jnp.float32)
    bo = s * jax.random.normal(ks[7], (E,), jnp.float32)
    return {
        "w_qkv": jnp.concatenate([wq, wk, wv], axis=1),   # (E, 3E), order q|k|v
        "b_qkv": jnp.concatenate([bq, bk, bv]),           # (3E,)
        "wo": wo,
        "bo": bo,
    }


def make_decoder_params(key, E, inner=2048):
    ks = jax.random.split(key, 6)
    s = 0.02
    return {
        "mha1": make_mha_params(ks[0], E),
        "mha2": make_mha_params(ks[1], E),
        "ln1_gamma": jnp.ones((E,), jnp.float32),
        "ln1_beta": jnp.zeros((E,), jnp.float32),
        "ln2_gamma": jnp.ones((E,), jnp.float32),
        "ln2_beta": jnp.zeros((E,), jnp.float32),
        "ln3_gamma": jnp.ones((E,), jnp.float32),
        "ln3_beta": jnp.zeros((E,), jnp.float32),
        "ff_w1": s * jax.random.normal(ks[2], (E, inner), jnp.float32),
        "ff_b1": s * jax.random.normal(ks[3], (inner,), jnp.float32),
        "ff_w2": s * jax.random.normal(ks[4], (inner, E), jnp.float32),
        "ff_b2": s * jax.random.normal(ks[5], (E,), jnp.float32),
    }


# -------------------------------- main ---------------------------------------

if __name__ == "__main__":
    B, S_TGT, S_ENC, E, HEADS = 2, 8, 8, 32, 4

    root = jax.random.PRNGKey(0)
    k_p, k_enc, k_tgt = jax.random.split(root, 3)

    params = make_decoder_params(k_p, E)
    encoder_out = jax.random.normal(k_enc, (B, S_ENC, E), jnp.float32)
    target = jax.random.normal(k_tgt, (B, S_TGT, E), jnp.float32)

    # target_mask: causal (B, S_tgt, S_tgt); x_mask: all-visible (B, S_tgt, S_enc)
    causal = jnp.tril(jnp.ones((S_TGT, S_TGT), jnp.float32))
    target_mask = jnp.broadcast_to(causal, (B, S_TGT, S_TGT))
    x_mask = jnp.ones((B, S_TGT, S_ENC), jnp.float32)

    fwd = jax.jit(functools.partial(decoder_layer, heads=HEADS))
    out = fwd(params, encoder_out, target, x_mask, target_mask)
    jax.block_until_ready(out)

    assert out.shape == (B, S_TGT, E), out.shape
    assert bool(jnp.all(jnp.isfinite(out)))
    print("KERNEL_OK")
</pallas_src>

<mosaic_0001>
module attributes {stable_mosaic.version = 11 : i64} {
  func.func @_linear_kernel(%arg0: i32, %arg1: memref<16x32xf32, #tpu.memory_space<vmem>>, %arg2: memref<32x96xf32, #tpu.memory_space<vmem>>, %arg3: memref<1x96xf32, #tpu.memory_space<vmem>>, %arg4: memref<16x96xf32, #tpu.memory_space<vmem>>) attributes {dimension_semantics = [#tpu.dimension_semantics<parallel>], iteration_bounds = array<i64: 1>, scalar_prefetch = 0 : i64, scratch_operands = 0 : i64, tpu.core_type = #tpu.core_type<tc>, window_params = [{transform_indices = @transform_0, window_bounds = array<i64: 16, 32>}, {pipeline_mode = #tpu.pipeline_mode<synchronous>, transform_indices = @transform_1, window_bounds = array<i64: 32, 96>}, {pipeline_mode = #tpu.pipeline_mode<synchronous>, transform_indices = @transform_2, window_bounds = array<i64: 1, 96>}, {transform_indices = @transform_3, window_bounds = array<i64: 16, 96>}]} {
    %c0 = arith.constant 0 : index
    %c0_0 = arith.constant 0 : index
    %0 = vector.load %arg1[%c0, %c0_0] : memref<16x32xf32, #tpu.memory_space<vmem>>, vector<16x32xf32>
    %c0_1 = arith.constant 0 : index
    %c0_2 = arith.constant 0 : index
    %1 = vector.load %arg2[%c0_1, %c0_2] : memref<32x96xf32, #tpu.memory_space<vmem>>, vector<32x96xf32>
    %cst = arith.constant dense<0.000000e+00> : vector<16x96xf32>
    %2 = tpu.matmul %0, %1, %cst {dimension_numbers = #tpu.dot_dimension_numbers<[1], [0], [0], [1], [0, 0, 1, 1], [], []>} : vector<16x32xf32>, vector<32x96xf32>, vector<16x96xf32> -> vector<16x96xf32>
    %c0_3 = arith.constant 0 : index
    %c0_4 = arith.constant 0 : index
    %3 = vector.load %arg3[%c0_3, %c0_4] : memref<1x96xf32, #tpu.memory_space<vmem>>, vector<1x96xf32>
    %4 = vector.broadcast %3 : vector<1x96xf32> to vector<16x96xf32>
    %5 = arith.addf %2, %4 : vector<16x96xf32>
    %c0_5 = arith.constant 0 : index
    %c0_6 = arith.constant 0 : index
    %6 = vector.load %arg4[%c0_5, %c0_6] : memref<16x96xf32, #tpu.memory_space<vmem>>, vector<16x96xf32>
    tpu.vector_store %arg4[%c0_5, %c0_6], %5 {strides = array<i32>} : memref<16x96xf32, #tpu.memory_space<vmem>>, vector<16x96xf32>,
    return
  }
  func.func @transform_0(%arg0: i32) -> (i32, i32) {
    %c0_i32 = arith.constant 0 : i32
    %c0_i32_0 = arith.constant 0 : i32
    return %arg0, %c0_i32 : i32, i32
  }
  func.func @transform_1(%arg0: i32) -> (i32, i32) {
    %c0_i32 = arith.constant 0 : i32
    %c0_i32_0 = arith.constant 0 : i32
    %c0_i32_1 = arith.constant 0 : i32
    return %c0_i32, %c0_i32_0 : i32, i32
  }
  func.func @transform_2(%arg0: i32) -> (i32, i32) {
    %c0_i32 = arith.constant 0 : i32
    %c0_i32_0 = arith.constant 0 : i32
    %c0_i32_1 = arith.constant 0 : i32
    return %c0_i32, %c0_i32_0 : i32, i32
  }
  func.func @transform_3(%arg0: i32) -> (i32, i32) {
    %c0_i32 = arith.constant 0 : i32
    %c0_i32_0 = arith.constant 0 : i32
    return %arg0, %c0_i32 : i32, i32
  }
}

module attributes {stable_mosaic.version = 11 : i64} {
  func.func @_linear_kernel(%arg0: i32, %arg1: memref<16x32xf32, #tpu.memory_space<vmem>>, %arg2: memref<32x64xf32, #tpu.memory_space<vmem>>, %arg3: memref<1x64xf32, #tpu.memory_space<vmem>>, %arg4: memref<16x64xf32, #tpu.memory_space<vmem>>) attributes {dimension_semantics = [#tpu.dimension_semantics<parallel>], iteration_bounds = array<i64: 1>, scalar_prefetch = 0 : i64, scratch_operands = 0 : i64, tpu.core_type = #tpu.core_type<tc>, window_params = [{transform_indices = @transform_0, window_bounds = array<i64: 16, 32>}, {pipeline_mode = #tpu.pipeline_mode<synchronous>, transform_indices = @transform_1, window_bounds = array<i64: 32, 64>}, {pipeline_mode = #tpu.pipeline_mode<synchronous>, transform_indices = @transform_2, window_bounds = array<i64: 1, 64>}, {transform_indices = @transform_3, window_bounds = array<i64: 16, 64>}]} {
    %c0 = arith.constant 0 : index
    %c0_0 = arith.constant 0 : index
    %0 = vector.load %arg1[%c0, %c0_0] : memref<16x32xf32, #tpu.memory_space<vmem>>, vector<16x32xf32>
    %c0_1 = arith.constant 0 : index
    %c0_2 = arith.constant 0 : index
    %1 = vector.load %arg2[%c0_1, %c0_2] : memref<32x64xf32, #tpu.memory_space<vmem>>, vector<32x64xf32>
    %cst = arith.constant dense<0.000000e+00> : vector<16x64xf32>
    %2 = tpu.matmul %0, %1, %cst {dimension_numbers = #tpu.dot_dimension_numbers<[1], [0], [0], [1], [0, 0, 1, 1], [], []>} : vector<16x32xf32>, vector<32x64xf32>, vector<16x64xf32> -> vector<16x64xf32>
    %c0_3 = arith.constant 0 : index
    %c0_4 = arith.constant 0 : index
    %3 = vector.load %arg3[%c0_3, %c0_4] : memref<1x64xf32, #tpu.memory_space<vmem>>, vector<1x64xf32>
    %4 = vector.broadcast %3 : vector<1x64xf32> to vector<16x64xf32>
    %5 = arith.addf %2, %4 : vector<16x64xf32>
    %c0_5 = arith.constant 0 : index
    %c0_6 = arith.constant 0 : index
    %6 = vector.load %arg4[%c0_5, %c0_6] : memref<16x64xf32, #tpu.memory_space<vmem>>, vector<16x64xf32>
    tpu.vector_store %arg4[%c0_5, %c0_6], %5 {strides = array<i32>} : memref<16x64xf32, #tpu.memory_space<vmem>>, vector<16x64xf32>,
    return
  }
  func.func @transform_0(%arg0: i32) -> (i32, i32) {
    %c0_i32 = arith.constant 0 : i32
    %c0_i32_0 = arith.constant 0 : i32
    return %arg0, %c0_i32 : i32, i32
  }
  func.func @transform_1(%arg0: i32) -> (i32, i32) {
    %c0_i32 = arith.constant 0 : i32
    %c0_i32_0 = arith.constant 0 : i32
    %c0_i32_1 = arith.constant 0 : i32
    return %c0_i32, %c0_i32_0 : i32, i32
  }
  func.func @transform_2(%arg0: i32) -> (i32, i32) {
    %c0_i32 = arith.constant 0 : i32
    %c0_i32_0 = arith.constant 0 : i32
    %c0_i32_1 = arith.constant 0 : i32
    return %c0_i32, %c0_i32_0 : i32, i32
  }
  func.func @transform_3(%arg0: i32) -> (i32, i32) {
    %c0_i32 = arith.constant 0 : i32
    %c0_i32_0 = arith.constant 0 : i32
    return %arg0, %c0_i32 : i32, i32
  }
}

module attributes {stable_mosaic.version = 11 : i64} {
  func.func @_linear_kernel(%arg0: i32, %arg1: memref<16x32xf32, #tpu.memory_space<vmem>>, %arg2: memref<32x32xf32, #tpu.memory_space<vmem>>, %arg3: memref<1x32xf32, #tpu.memory_space<vmem>>, %arg4: memref<16x32xf32, #tpu.memory_space<vmem>>) attributes {dimension_semantics = [#tpu.dimension_semantics<parallel>], iteration_bounds = array<i64: 1>, scalar_prefetch = 0 : i64, scratch_operands = 0 : i64, tpu.core_type = #tpu.core_type<tc>, window_params = [{transform_indices = @transform_0, window_bounds = array<i64: 16, 32>}, {pipeline_mode = #tpu.pipeline_mode<synchronous>, transform_indices = @transform_1, window_bounds = array<i64: 32, 32>}, {pipeline_mode = #tpu.pipeline_mode<synchronous>, transform_indices = @transform_2, window_bounds = array<i64: 1, 32>}, {transform_indices = @transform_3, window_bounds = array<i64: 16, 32>}]} {
    %c0 = arith.constant 0 : index
    %c0_0 = arith.constant 0 : index
    %0 = vector.load %arg1[%c0, %c0_0] : memref<16x32xf32, #tpu.memory_space<vmem>>, vector<16x32xf32>
    %c0_1 = arith.constant 0 : index
    %c0_2 = arith.constant 0 : index
    %1 = vector.load %arg2[%c0_1, %c0_2] : memref<32x32xf32, #tpu.memory_space<vmem>>, vector<32x32xf32>
    %cst = arith.constant dense<0.000000e+00> : vector<16x32xf32>
    %2 = tpu.matmul %0, %1, %cst {dimension_numbers = #tpu.dot_dimension_numbers<[1], [0], [0], [1], [0, 0, 1, 1], [], []>} : vector<16x32xf32>, vector<32x32xf32>, vector<16x32xf32> -> vector<16x32xf32>
    %c0_3 = arith.constant 0 : index
    %c0_4 = arith.constant 0 : index
    %3 = vector.load %arg3[%c0_3, %c0_4] : memref<1x32xf32, #tpu.memory_space<vmem>>, vector<1x32xf32>
    %4 = vector.broadcast %3 : vector<1x32xf32> to vector<16x32xf32>
    %5 = arith.addf %2, %4 : vector<16x32xf32>
    %c0_5 = arith.constant 0 : index
    %c0_6 = arith.constant 0 : index
    %6 = vector.load %arg4[%c0_5, %c0_6] : memref<16x32xf32, #tpu.memory_space<vmem>>, vector<16x32xf32>
    tpu.vector_store %arg4[%c0_5, %c0_6], %5 {strides = array<i32>} : memref<16x32xf32, #tpu.memory_space<vmem>>, vector<16x32xf32>,
    return
  }
  func.func @transform_0(%arg0: i32) -> (i32, i32) {
    %c0_i32 = arith.constant 0 : i32
    %c0_i32_0 = arith.constant 0 : i32
    return %arg0, %c0_i32 : i32, i32
  }
  func.func @transform_1(%arg0: i32) -> (i32, i32) {
    %c0_i32 = arith.constant 0 : i32
    %c0_i32_0 = arith.constant 0 : i32
    %c0_i32_1 = arith.constant 0 : i32
    return %c0_i32, %c0_i32_0 : i32, i32
  }
  func.func @transform_2(%arg0: i32) -> (i32, i32) {
    %c0_i32 = arith.constant 0 : i32
    %c0_i32_0 = arith.constant 0 : i32
    %c0_i32_1 = arith.constant 0 : i32
    return %c0_i32, %c0_i32_0 : i32, i32
  }
  func.func @transform_3(%arg0: i32) -> (i32, i32) {
    %c0_i32 = arith.constant 0 : i32
    %c0_i32_0 = arith.constant 0 : i32
    return %arg0, %c0_i32 : i32, i32
  }
}

module attributes {stable_mosaic.version = 11 : i64} {
  func.func @_mha_core_kernel(%arg0: i32, %arg1: memref<1x4x8x8xf32, #tpu.memory_space<vmem>>, %arg2: memref<1x4x8x8xf32, #tpu.memory_space<vmem>>, %arg3: memref<1x4x8x8xf32, #tpu.memory_space<vmem>>, %arg4: memref<1x8x8xf32, #tpu.memory_space<vmem>>, %arg5: memref<4x8x32xf32, #tpu.memory_space<vmem>>, %arg6: memref<1x32xf32, #tpu.memory_space<vmem>>, %arg7: memref<1x8x32xf32, #tpu.memory_space<vmem>>, %arg8: memref<1x32xf32, #tpu.memory_space<vmem>>, %arg9: memref<1x32xf32, #tpu.memory_space<vmem>>, %arg10: memref<1x8x32xf32, #tpu.memory_space<vmem>>) attributes {dimension_semantics = [#tpu.dimension_semantics<parallel>], iteration_bounds = array<i64: 2>, scalar_prefetch = 0 : i64, scratch_operands = 0 : i64, tpu.core_type = #tpu.core_type<tc>, window_params = [{transform_indices = @transform_0, window_bounds = array<i64: 1, 4, 8, 8>}, {transform_indices = @transform_1, window_bounds = array<i64: 1, 4, 8, 8>}, {transform_indices = @transform_2, window_bounds = array<i64: 1, 4, 8, 8>}, {transform_indices = @transform_3, window_bounds = array<i64: 1, 8, 8>}, {pipeline_mode = #tpu.pipeline_mode<synchronous>, transform_indices = @transform_4, window_bounds = array<i64: 4, 8, 32>}, {pipeline_mode = #tpu.pipeline_mode<synchronous>, transform_indices = @transform_5, window_bounds = array<i64: 1, 32>}, {transform_indices = @transform_6, window_bounds = array<i64: 1, 8, 32>}, {pipeline_mode = #tpu.pipeline_mode<synchronous>, transform_indices = @transform_7, window_bounds = array<i64: 1, 32>}, {pipeline_mode = #tpu.pipeline_mode<synchronous>, transform_indices = @transform_8, window_bounds = array<i64: 1, 32>}, {transform_indices = @transform_9, window_bounds = array<i64: 1, 8, 32>}]} {
    %c0 = arith.constant 0 : index
    %c0_0 = arith.constant 0 : index
    %c0_1 = arith.constant 0 : index
    %c0_2 = arith.constant 0 : index
    %0 = vector.load %arg1[%c0, %c0_0, %c0_1, %c0_2] : memref<1x4x8x8xf32, #tpu.memory_space<vmem>>, vector<1x4x8x8xf32>
    %1 = vector.shape_cast %0 : vector<1x4x8x8xf32> to vector<4x8x8xf32>
    %c0_3 = arith.constant 0 : index
    %c0_4 = arith.constant 0 : index
    %c0_5 = arith.constant 0 : index
    %c0_6 = arith.constant 0 : index
    %2 = vector.load %arg2[%c0_3, %c0_4, %c0_5, %c0_6] : memref<1x4x8x8xf32, #tpu.memory_space<vmem>>, vector<1x4x8x8xf32>
    %3 = vector.shape_cast %2 : vector<1x4x8x8xf32> to vector<4x8x8xf32>
    %c0_7 = arith.constant 0 : index
    %c0_8 = arith.constant 0 : index
    %c0_9 = arith.constant 0 : index
    %c0_10 = arith.constant 0 : index
    %4 = vector.load %arg3[%c0_7, %c0_8, %c0_9, %c0_10] : memref<1x4x8x8xf32, #tpu.memory_space<vmem>>, vector<1x4x8x8xf32>
    %5 = vector.shape_cast %4 : vector<1x4x8x8xf32> to vector<4x8x8xf32>
    "tpu.trace_start"() <{level = 10 : i32, message = "hqd,hkd->hqk"}> : () -> ()
    %cst = arith.constant dense<0.000000e+00> : vector<4x8x8xf32>
    %6 = tpu.matmul %1, %3, %cst {dimension_numbers = #tpu.dot_dimension_numbers<[2], [2], [1], [1], [0, 0, 0, 1, 1, 1], [0], [0]>} : vector<4x8x8xf32>, vector<4x8x8xf32>, vector<4x8x8xf32> -> vector<4x8x8xf32>
    "tpu.trace_stop"() : () -> ()
    %cst_11 = arith.constant 0.353553385 : f32
    %7 = vector.broadcast %cst_11 : f32 to vector<4x8x8xf32>
    %8 = arith.mulf %6, %7 : vector<4x8x8xf32>
    %c0_12 = arith.constant 0 : index
    %c0_13 = arith.constant 0 : index
    %c0_14 = arith.constant 0 : index
    %9 = vector.load %arg4[%c0_12, %c0_13, %c0_14] : memref<1x8x8xf32, #tpu.memory_space<vmem>>, vector<1x8x8xf32>
    %cst_15 = arith.constant 0.000000e+00 : f32
    %10 = vector.broadcast %cst_15 : f32 to vector<1x8x8xf32>
    %11 = arith.cmpf oeq, %9, %10 : vector<1x8x8xf32>
    %cst_16 = arith.constant -1.000000e+10 : f32
    %12 = vector.shape_cast %11 : vector<1x8x8xi1> to vector<1x8x8xi1>
    %13 = vector.broadcast %12 : vector<1x8x8xi1> to vector<4x8x8xi1>
    %14 = vector.broadcast %cst_16 : f32 to vector<4x8x8xf32>
    %15 = arith.select %13, %14, %8 : vector<4x8x8xi1>, vector<4x8x8xf32>
    %cst_17 = arith.constant dense<0xFF800000> : vector<4x8xf32>
    %16 = vector.multi_reduction <maximumf>, %15, %cst_17 [2] : vector<4x8x8xf32> to vector<4x8xf32>
    %17 = vector.shape_cast %16 : vector<4x8xf32> to vector<4x8x1xf32>
    %18 = vector.broadcast %17 : vector<4x8x1xf32> to vector<4x8x8xf32>
    %19 = arith.subf %15, %18 : vector<4x8x8xf32>
    %20 = math.exp %19 : vector<4x8x8xf32>
    %cst_18 = arith.constant dense<0.000000e+00> : vector<4x8xf32>
    %21 = vector.multi_reduction <add>, %20, %cst_18 [2] : vector<4x8x8xf32> to vector<4x8xf32>
    %22 = vector.shape_cast %21 : vector<4x8xf32> to vector<4x8x1xf32>
    %23 = tpu.reciprocal %22 {approx = true} : vector<4x8x1xf32> -> vector<4x8x1xf32>
    %24 = vector.broadcast %23 : vector<4x8x1xf32> to vector<4x8x8xf32>
    %25 = arith.mulf %20, %24 : vector<4x8x8xf32>
    "tpu.trace_start"() <{level = 10 : i32, message = "hqk,hkd->hqd"}> : () -> ()
    %cst_19 = arith.constant dense<0.000000e+00> : vector<4x8x8xf32>
    %26 = tpu.matmul %25, %5, %cst_19 {dimension_numbers = #tpu.dot_dimension_numbers<[2], [1], [1], [2], [0, 0, 0, 1, 1, 2], [0], [0]>} : vector<4x8x8xf32>, vector<4x8x8xf32>, vector<4x8x8xf32> -> vector<4x8x8xf32>
    "tpu.trace_stop"() : () -> ()
    %c0_20 = arith.constant 0 : index
    %c0_21 = arith.constant 0 : index
    %c0_22 = arith.constant 0 : index
    %27 = vector.load %arg5[%c0_20, %c0_21, %c0_22] : memref<4x8x32xf32, #tpu.memory_space<vmem>>, vector<4x8x32xf32>
    "tpu.trace_start"() <{level = 10 : i32, message = "hqd,hde->hqe"}> : () -> ()
    %cst_23 = arith.constant dense<0.000000e+00> : vector<4x8x32xf32>
    %28 = tpu.matmul %26, %27, %cst_23 {dimension_numbers = #tpu.dot_dimension_numbers<[2], [1], [1], [2], [0, 0, 0, 1, 1, 2], [0], [0]>} : vector<4x8x8xf32>, vector<4x8x32xf32>, vector<4x8x32xf32> -> vector<4x8x32xf32>
    "tpu.trace_stop"() : () -> ()
    %cst_24 = arith.constant dense<0.000000e+00> : vector<8x32xf32>
    %29 = vector.multi_reduction <add>, %28, %cst_24 [0] : vector<4x8x32xf32> to vector<8x32xf32>
    %c0_25 = arith.constant 0 : index
    %c0_26 = arith.constant 0 : index
    %30 = vector.load %arg6[%c0_25, %c0_26] : memref<1x32xf32, #tpu.memory_space<vmem>>, vector<1x32xf32>
    %31 = vector.broadcast %30 : vector<1x32xf32> to vector<8x32xf32>
    %32 = arith.addf %29, %31 : vector<8x32xf32>
    %c0_27 = arith.constant 0 : index
    %c0_28 = arith.constant 0 : index
    %c0_29 = arith.constant 0 : index
    %33 = vector.load %arg7[%c0_27, %c0_28, %c0_29] : memref<1x8x32xf32, #tpu.memory_space<vmem>>, vector<1x8x32xf32>
    %34 = vector.shape_cast %33 : vector<1x8x32xf32> to vector<8x32xf32>
    %35 = arith.addf %32, %34 : vector<8x32xf32>
    %c0_30 = arith.constant 0 : index
    %c0_31 = arith.constant 0 : index
    %36 = vector.load %arg8[%c0_30, %c0_31] : memref<1x32xf32, #tpu.memory_space<vmem>>, vector<1x32xf32>
    %c0_32 = arith.constant 0 : index
    %c0_33 = arith.constant 0 : index
    %37 = vector.load %arg9[%c0_32, %c0_33] : memref<1x32xf32, #tpu.memory_space<vmem>>, vector<1x32xf32>
    %cst_34 = arith.constant dense<0.000000e+00> : vector<8xf32>
    %38 = vector.multi_reduction <add>, %35, %cst_34 [1] : vector<8x32xf32> to vector<8xf32>
    %39 = vector.shape_cast %38 : vector<8xf32> to vector<8x1xf32>
    %cst_35 = arith.constant 3.200000e+01 : f32
    %40 = vector.broadcast %cst_35 : f32 to vector<8x1xf32>
    %41 = arith.divf %39, %40 : vector<8x1xf32>
    %42 = vector.broadcast %41 : vector<8x1xf32> to vector<8x32xf32>
    %43 = arith.subf %35, %42 : vector<8x32xf32>
    %44 = arith.mulf %43, %43 : vector<8x32xf32>
    %cst_36 = arith.constant dense<0.000000e+00> : vector<8xf32>
    %45 = vector.multi_reduction <add>, %44, %cst_36 [1] : vector<8x32xf32> to vector<8xf32>
    %46 = vector.shape_cast %45 : vector<8xf32> to vector<8x1xf32>
    %cst_37 = arith.constant 0.0322580636 : f32
    %47 = vector.broadcast %cst_37 : f32 to vector<8x1xf32>
    %48 = arith.mulf %46, %47 : vector<8x1xf32>
    %49 = math.sqrt %48 : vector<8x1xf32>
    %50 = vector.broadcast %36 : vector<1x32xf32> to vector<8x32xf32>
    %51 = arith.mulf %50, %43 : vector<8x32xf32>
    %cst_38 = arith.constant 9.99999997E-7 : f32
    %52 = vector.broadcast %cst_38 : f32 to vector<8x1xf32>
    %53 = arith.addf %49, %52 : vector<8x1xf32>
    %54 = vector.broadcast %53 : vector<8x1xf32> to vector<8x32xf32>
    %55 = arith.divf %51, %54 : vector<8x32xf32>
    %56 = vector.broadcast %37 : vector<1x32xf32> to vector<8x32xf32>
    %57 = arith.addf %55, %56 : vector<8x32xf32>
    %c0_39 = arith.constant 0 : index
    %c0_40 = arith.constant 0 : index
    %c0_41 = arith.constant 0 : index
    %58 = vector.load %arg10[%c0_39, %c0_40, %c0_41] : memref<1x8x32xf32, #tpu.memory_space<vmem>>, vector<1x8x32xf32>
    %59 = vector.shape_cast %58 : vector<1x8x32xf32> to vector<8x32xf32>
    %60 = vector.shape_cast %57 : vector<8x32xf32> to vector<1x8x32xf32>
    tpu.vector_store %arg10[%c0_39, %c0_40, %c0_41], %60 {strides = array<i32>} : memref<1x8x32xf32, #tpu.memory_space<vmem>>, vector<1x8x32xf32>,
    return
  }
  func.func @transform_0(%arg0: i32) -> (i32, i32, i32, i32) {
    %c0_i32 = arith.constant 0 : i32
    %c0_i32_0 = arith.constant 0 : i32
    %c0_i32_1 = arith.constant 0 : i32
    %c0_i32_2 = arith.constant 0 : i32
    return %arg0, %c0_i32, %c0_i32_0, %c0_i32_1 : i32, i32, i32, i32
  }
  func.func @transform_1(%arg0: i32) -> (i32, i32, i32, i32) {
    %c0_i32 = arith.constant 0 : i32
    %c0_i32_0 = arith.constant 0 : i32
    %c0_i32_1 = arith.constant 0 : i32
    %c0_i32_2 = arith.constant 0 : i32
    return %arg0, %c0_i32, %c0_i32_0, %c0_i32_1 : i32, i32, i32, i32
  }
  func.func @transform_2(%arg0: i32) -> (i32, i32, i32, i32) {
    %c0_i32 = arith.constant 0 : i32
    %c0_i32_0 = arith.constant 0 : i32
    %c0_i32_1 = arith.constant 0 : i32
    %c0_i32_2 = arith.constant 0 : i32
    return %arg0, %c0_i32, %c0_i32_0, %c0_i32_1 : i32, i32, i32, i32
  }
  func.func @transform_3(%arg0: i32) -> (i32, i32, i32) {
    %c0_i32 = arith.constant 0 : i32
    %c0_i32_0 = arith.constant 0 : i32
    %c0_i32_1 = arith.constant 0 : i32
    return %arg0, %c0_i32, %c0_i32_0 : i32, i32, i32
  }
  func.func @transform_4(%arg0: i32) -> (i32, i32, i32) {
    %c0_i32 = arith.constant 0 : i32
    %c0_i32_0 = arith.constant 0 : i32
    %c0_i32_1 = arith.constant 0 : i32
    %c0_i32_2 = arith.constant 0 : i32
    return %c0_i32, %c0_i32_0, %c0_i32_1 : i32, i32, i32
  }
  func.func @transform_5(%arg0: i32) -> (i32, i32) {
    %c0_i32 = arith.constant 0 : i32
    %c0_i32_0 = arith.constant 0 : i32
    %c0_i32_1 = arith.constant 0 : i32
    return %c0_i32, %c0_i32_0 : i32, i32
  }
  func.func @transform_6(%arg0: i32) -> (i32, i32, i32) {
    %c0_i32 = arith.constant 0 : i32
    %c0_i32_0 = arith.constant 0 : i32
    %c0_i32_1 = arith.constant 0 : i32
    return %arg0, %c0_i32, %c0_i32_0 : i32, i32, i32
  }
  func.func @transform_7(%arg0: i32) -> (i32, i32) {
    %c0_i32 = arith.constant 0 : i32
    %c0_i32_0 = arith.constant 0 : i32
    %c0_i32_1 = arith.constant 0 : i32
    return %c0_i32, %c0_i32_0 : i32, i32
  }
  func.func @transform_8(%arg0: i32) -> (i32, i32) {
    %c0_i32 = arith.constant 0 : i32
    %c0_i32_0 = arith.constant 0 : i32
    %c0_i32_1 = arith.constant 0 : i32
    return %c0_i32, %c0_i32_0 : i32, i32
  }
  func.func @transform_9(%arg0: i32) -> (i32, i32, i32) {
    %c0_i32 = arith.constant 0 : i32
    %c0_i32_0 = arith.constant 0 : i32
    %c0_i32_1 = arith.constant 0 : i32
    return %arg0, %c0_i32, %c0_i32_0 : i32, i32, i32
  }
}

module attributes {stable_mosaic.version = 11 : i64} {
  func.func @_ffn_res_ln_kernel(%arg0: i32, %arg1: memref<16x32xf32, #tpu.memory_space<vmem>>, %arg2: memref<32x2048xf32, #tpu.memory_space<vmem>>, %arg3: memref<1x2048xf32, #tpu.memory_space<vmem>>, %arg4: memref<2048x32xf32, #tpu.memory_space<vmem>>, %arg5: memref<1x32xf32, #tpu.memory_space<vmem>>, %arg6: memref<1x32xf32, #tpu.memory_space<vmem>>, %arg7: memref<1x32xf32, #tpu.memory_space<vmem>>, %arg8: memref<16x32xf32, #tpu.memory_space<vmem>>) attributes {dimension_semantics = [#tpu.dimension_semantics<parallel>], iteration_bounds = array<i64: 1>, scalar_prefetch = 0 : i64, scratch_operands = 0 : i64, tpu.core_type = #tpu.core_type<tc>, window_params = [{transform_indices = @transform_0, window_bounds = array<i64: 16, 32>}, {pipeline_mode = #tpu.pipeline_mode<synchronous>, transform_indices = @transform_1, window_bounds = array<i64: 32, 2048>}, {pipeline_mode = #tpu.pipeline_mode<synchronous>, transform_indices = @transform_2, window_bounds = array<i64: 1, 2048>}, {pipeline_mode = #tpu.pipeline_mode<synchronous>, transform_indices = @transform_3, window_bounds = array<i64: 2048, 32>}, {pipeline_mode = #tpu.pipeline_mode<synchronous>, transform_indices = @transform_4, window_bounds = array<i64: 1, 32>}, {pipeline_mode = #tpu.pipeline_mode<synchronous>, transform_indices = @transform_5, window_bounds = array<i64: 1, 32>}, {pipeline_mode = #tpu.pipeline_mode<synchronous>, transform_indices = @transform_6, window_bounds = array<i64: 1, 32>}, {transform_indices = @transform_7, window_bounds = array<i64: 16, 32>}]} {
    %c0 = arith.constant 0 : index
    %c0_0 = arith.constant 0 : index
    %0 = vector.load %arg1[%c0, %c0_0] : memref<16x32xf32, #tpu.memory_space<vmem>>, vector<16x32xf32>
    %c0_1 = arith.constant 0 : index
    %c0_2 = arith.constant 0 : index
    %1 = vector.load %arg2[%c0_1, %c0_2] : memref<32x2048xf32, #tpu.memory_space<vmem>>, vector<32x2048xf32>
    %cst = arith.constant dense<0.000000e+00> : vector<16x2048xf32>
    %2 = tpu.matmul %0, %1, %cst {dimension_numbers = #tpu.dot_dimension_numbers<[1], [0], [0], [1], [0, 0, 1, 1], [], []>} : vector<16x32xf32>, vector<32x2048xf32>, vector<16x2048xf32> -> vector<16x2048xf32>
    %c0_3 = arith.constant 0 : index
    %c0_4 = arith.constant 0 : index
    %3 = vector.load %arg3[%c0_3, %c0_4] : memref<1x2048xf32, #tpu.memory_space<vmem>>, vector<1x2048xf32>
    %4 = vector.broadcast %3 : vector<1x2048xf32> to vector<16x2048xf32>
    %5 = arith.addf %2, %4 : vector<16x2048xf32>
    %cst_5 = arith.constant 0.000000e+00 : f32
    %6 = vector.broadcast %cst_5 : f32 to vector<16x2048xf32>
    %7 = arith.maximumf %5, %6 : vector<16x2048xf32>
    %c0_6 = arith.constant 0 : index
    %c0_7 = arith.constant 0 : index
    %8 = vector.load %arg4[%c0_6, %c0_7] : memref<2048x32xf32, #tpu.memory_space<vmem>>, vector<2048x32xf32>
    %cst_8 = arith.constant dense<0.000000e+00> : vector<16x32xf32>
    %9 = tpu.matmul %7, %8, %cst_8 {dimension_numbers = #tpu.dot_dimension_numbers<[1], [0], [0], [1], [0, 0, 1, 1], [], []>} : vector<16x2048xf32>, vector<2048x32xf32>, vector<16x32xf32> -> vector<16x32xf32>
    %c0_9 = arith.constant 0 : index
    %c0_10 = arith.constant 0 : index
    %10 = vector.load %arg5[%c0_9, %c0_10] : memref<1x32xf32, #tpu.memory_space<vmem>>, vector<1x32xf32>
    %11 = vector.broadcast %10 : vector<1x32xf32> to vector<16x32xf32>
    %12 = arith.addf %9, %11 : vector<16x32xf32>
    %13 = arith.addf %12, %0 : vector<16x32xf32>
    %c0_11 = arith.constant 0 : index
    %c0_12 = arith.constant 0 : index
    %14 = vector.load %arg6[%c0_11, %c0_12] : memref<1x32xf32, #tpu.memory_space<vmem>>, vector<1x32xf32>
    %c0_13 = arith.constant 0 : index
    %c0_14 = arith.constant 0 : index
    %15 = vector.load %arg7[%c0_13, %c0_14] : memref<1x32xf32, #tpu.memory_space<vmem>>, vector<1x32xf32>
    %cst_15 = arith.constant dense<0.000000e+00> : vector<16xf32>
    %16 = vector.multi_reduction <add>, %13, %cst_15 [1] : vector<16x32xf32> to vector<16xf32>
    %17 = vector.shape_cast %16 : vector<16xf32> to vector<16x1xf32>
    %cst_16 = arith.constant 3.200000e+01 : f32
    %18 = vector.broadcast %cst_16 : f32 to vector<16x1xf32>
    %19 = arith.divf %17, %18 : vector<16x1xf32>
    %20 = vector.broadcast %19 : vector<16x1xf32> to vector<16x32xf32>
    %21 = arith.subf %13, %20 : vector<16x32xf32>
    %22 = arith.mulf %21, %21 : vector<16x32xf32>
    %cst_17 = arith.constant dense<0.000000e+00> : vector<16xf32>
    %23 = vector.multi_reduction <add>, %22, %cst_17 [1] : vector<16x32xf32> to vector<16xf32>
    %24 = vector.shape_cast %23 : vector<16xf32> to vector<16x1xf32>
    %cst_18 = arith.constant 0.0322580636 : f32
    %25 = vector.broadcast %cst_18 : f32 to vector<16x1xf32>
    %26 = arith.mulf %24, %25 : vector<16x1xf32>
    %27 = math.sqrt %26 : vector<16x1xf32>
    %28 = vector.broadcast %14 : vector<1x32xf32> to vector<16x32xf32>
    %29 = arith.mulf %28, %21 : vector<16x32xf32>
    %cst_19 = arith.constant 9.99999997E-7 : f32
    %30 = vector.broadcast %cst_19 : f32 to vector<16x1xf32>
    %31 = arith.addf %27, %30 : vector<16x1xf32>
    %32 = vector.broadcast %31 : vector<16x1xf32> to vector<16x32xf32>
    %33 = arith.divf %29, %32 : vector<16x32xf32>
    %34 = vector.broadcast %15 : vector<1x32xf32> to vector<16x32xf32>
    %35 = arith.addf %33, %34 : vector<16x32xf32>
    %c0_20 = arith.constant 0 : index
    %c0_21 = arith.constant 0 : index
    %36 = vector.load %arg8[%c0_20, %c0_21] : memref<16x32xf32, #tpu.memory_space<vmem>>, vector<16x32xf32>
    tpu.vector_store %arg8[%c0_20, %c0_21], %35 {strides = array<i32>} : memref<16x32xf32, #tpu.memory_space<vmem>>, vector<16x32xf32>,
    return
  }
  func.func @transform_0(%arg0: i32) -> (i32, i32) {
    %c0_i32 = arith.constant 0 : i32
    %c0_i32_0 = arith.constant 0 : i32
    return %arg0, %c0_i32 : i32, i32
  }
  func.func @transform_1(%arg0: i32) -> (i32, i32) {
    %c0_i32 = arith.constant 0 : i32
    %c0_i32_0 = arith.constant 0 : i32
    %c0_i32_1 = arith.constant 0 : i32
    return %c0_i32, %c0_i32_0 : i32, i32
  }
  func.func @transform_2(%arg0: i32) -> (i32, i32) {
    %c0_i32 = arith.constant 0 : i32
    %c0_i32_0 = arith.constant 0 : i32
    %c0_i32_1 = arith.constant 0 : i32
    return %c0_i32, %c0_i32_0 : i32, i32
  }
  func.func @transform_3(%arg0: i32) -> (i32, i32) {
    %c0_i32 = arith.constant 0 : i32
    %c0_i32_0 = arith.constant 0 : i32
    %c0_i32_1 = arith.constant 0 : i32
    return %c0_i32, %c0_i32_0 : i32, i32
  }
  func.func @transform_4(%arg0: i32) -> (i32, i32) {
    %c0_i32 = arith.constant 0 : i32
    %c0_i32_0 = arith.constant 0 : i32
    %c0_i32_1 = arith.constant 0 : i32
    return %c0_i32, %c0_i32_0 : i32, i32
  }
  func.func @transform_5(%arg0: i32) -> (i32, i32) {
    %c0_i32 = arith.constant 0 : i32
    %c0_i32_0 = arith.constant 0 : i32
    %c0_i32_1 = arith.constant 0 : i32
    return %c0_i32, %c0_i32_0 : i32, i32
  }
  func.func @transform_6(%arg0: i32) -> (i32, i32) {
    %c0_i32 = arith.constant 0 : i32
    %c0_i32_0 = arith.constant 0 : i32
    %c0_i32_1 = arith.constant 0 : i32
    return %c0_i32, %c0_i32_0 : i32, i32
  }
  func.func @transform_7(%arg0: i32) -> (i32, i32) {
    %c0_i32 = arith.constant 0 : i32
    %c0_i32_0 = arith.constant 0 : i32
    return %arg0, %c0_i32 : i32, i32
  }
}

</mosaic_0001>

<bundles_post_ra>
// kernel: decoder_layer.6
= control target key start
LH: loop header
LB: loop body
LE: loop exit
PB: predicated region body
PF: predicated region fallthrough
CT: control target
= control target key end

     0   :  { %8 = vsyncpa [#allocation3], 0  ;;  %s197_s0 = inlined_call_operand.hbm [shape: f32[16,32], index: 0, kind: input, shape index: {}]   ;;  %s198_s1 = inlined_call_operand.hbm [shape: f32[32,96], index: 1, kind: input, shape index: {}]   ;;  %s199_s2 = inlined_call_operand.vmem [shape: f32[1,96], index: 2, kind: input, shape index: {}]   ;;  %s200_s3 = inlined_call_operand.vmem [shape: f32[16,96], index: 3, kind: output, shape index: {}]  }
   0x1   :  { %s14_s14 = sshll.u32 %s197_s0, 4  ;;  %s15_s14 = int_to_ptr.hbm [resolvable:$true] %s14_s14 }
   0x2   :  { %9 = vsyncpa [#allocation5], 0  ;;  %s158_s15 = smov [#allocation2]   ;;  %s27_s19 = sshll.u32 %s198_s1, 4  ;;  %s28_s19 = int_to_ptr.hbm [resolvable:$true] %s27_s19 }
   0x3   :  { %s16_s16 = sshll.u32 %s158_s15, 4  ;;  %s159_s20 = smov 128   ;;  %s17_s16 = int_to_ptr.vmem [resolvable:$true] %s16_s16 }
   0x4   :  { %s160_s21 = smov 8   ;;  %s161_s22 = smov [#allocation4]  }
   0x5   :  { %22 = dma.hbm_to_vmem [thread:$0]  %s15_s14, 256, %s17_s16, [#allocation3], %s159_s20, %s159_s20, %s160_s21  }
   0x6   :  { %s29_s23 = sshll.u32 %s161_s22, 4  ;;  %s30_s23 = int_to_ptr.vmem [resolvable:$true] %s29_s23 }
   0x7   :  { %35 = dma.hbm_to_vmem [thread:$0]  %s28_s19, 512, %s30_s23, [#allocation5], %s159_s20, %s159_s20, %s160_s21  }
   0x8   :  { %154 = dma.done.wait [#allocation3], 256  }
   0x9   :  { %155 = vsyncadd [#allocation3], 4294967040 }
   0xa   :  { %156 = dma.done.wait [#allocation5], 512  }
   0xb   :  { %157 = vsyncadd [#allocation5], 4294966784  ;;  %v51_v0 = vld [vmem:[#allocation4 + $0x18] sm:$0xff]  ;;  %v50_v1 = vld [vmem:[#allocation4 + $0x10] sm:$0xff]  ;;  %vm56_vm0 = vcmask 261120   ;;  %vm86_vm1 = vcmask 785408  }
   0xc   :  { %75 = vmatpush.msra.mxu0 %v51_v0  ;;  %97 = vmatpush.msra.mxu1 %v51_v0  ;;  %v49_v2 = vld [vmem:[#allocation4 + $0x8] sm:$0xff]  ;;  %v48_v3 = vld [vmem:[#allocation4] sm:$0xff]  ;;  %v46_v4 = vld [vmem:[#allocation2] sm:$0xff] }
   0xd   :  { %v47_v5 = vld [vmem:[#allocation2 + $0x8] sm:$0xff]  ;;  %v105_v6 = vld [vmem:[%s199_s2] ss:$0 sm:$0xff] }
   0xe   :  { %76 = vmatpush.msra.mxu0 %v50_v1  ;;  %98 = vmatpush.msra.mxu1 %v50_v1 }
  0x10   :  { %77 = vmatpush.msra.mxu0 %v49_v2  ;;  %99 = vmatpush.msra.mxu1 %v49_v2 }
  0x12   :  { %78 = vmatpush.msra.mxu0 %v48_v3  ;;  %100 = vmatpush.msra.mxu1 %v48_v3 }
  0x13   :  { %95 = vmatmul.msk.f32.vlgmr.msra.gmra.mxu0 %vm56_vm0, %v46_v4  ;;  %96 = vmatmul.msk.f32.vlgmr.msra.gmra.mxu1 %vm56_vm0, %v47_v5 }
  0x90   :  { %v80_v7 = vpop.f32.mrf.mxu0  ;;  %v83_v8 = vpop.f32.mrf.mxu1 }
  0x91   :  { %v81_v9 = vadd.f32 %v105_v6, %v80_v7  ;;  %v84_v10 = vadd.f32 %v105_v6, %v83_v8 }
  0x93   :  { %87 = vst.msk [vmem:[%s200_s3] sm:$0xff] %vm86_vm1, %v81_v9 }
  0x94   :  { %88 = vst.msk [vmem:[%s200_s3 + $0x8] sm:$0xff] %vm86_vm1, %v84_v10 }
  0x95   :  { %93 = vsyncpa [#allocation3], 1 }
  0x96   :  { %94 = vsyncpa [#allocation5], 1 }

// kernel: decoder_layer.9
= control target key start
LH: loop header
LB: loop body
LE: loop exit
PB: predicated region body
PF: predicated region fallthrough
CT: control target
= control target key end

     0   :  { %vm24_vm0 = vcmask 261120   ;;  %vm54_vm1 = vcmask 523264   ;;  %s115_s1 = inlined_call_operand.vmem [shape: f32[32,64], index: 1, kind: input, shape index: {}]   ;;  %s116_s2 = inlined_call_operand.vmem [shape: f32[1,64], index: 2, kind: input, shape index: {}]   ;;  %s117_s0 = inlined_call_operand.vmem [shape: f32[16,32], index: 0, kind: input, shape index: {}]   ;;  %s118_s3 = inlined_call_operand.vmem [shape: f32[16,64], index: 3, kind: output, shape index: {}]  }
   0x1   :  { %v19_v0 = vld [vmem:[%s115_s1 + $0x18] sm:$0xff]  ;;  %v18_v1 = vld [vmem:[%s115_s1 + $0x10] sm:$0xff]  ;;  %v17_v2 = vld [vmem:[%s115_s1 + $0x8] sm:$0xff] }
   0x2   :  { %43 = vmatpush.msra.mxu0 %v19_v0  ;;  %63 = vmatpush.msra.mxu1 %v19_v0  ;;  %v16_v3 = vld [vmem:[%s115_s1] sm:$0xff]  ;;  %v15_v5 = vld [vmem:[%s117_s0 + $0x8] sm:$0xff] }
   0x3   :  { %v14_v4 = vld [vmem:[%s117_s0] sm:$0xff] }
   0x4   :  { %44 = vmatpush.msra.mxu0 %v18_v1  ;;  %64 = vmatpush.msra.mxu1 %v18_v1  ;;  %v67_v6 = vld [vmem:[%s116_s2] ss:$0 sm:$0xff] }
   0x6   :  { %45 = vmatpush.msra.mxu0 %v17_v2  ;;  %65 = vmatpush.msra.mxu1 %v17_v2 }
   0x8   :  { %46 = vmatpush.msra.mxu0 %v16_v3  ;;  %66 = vmatpush.msra.mxu1 %v16_v3 }
   0x9   :  { %61 = vmatmul.msk.f32.vlgmr.msra.gmra.mxu0 %vm24_vm0, %v14_v4  ;;  %62 = vmatmul.msk.f32.vlgmr.msra.gmra.mxu1 %vm24_vm0, %v15_v5 }
  0x86   :  { %v48_v7 = vpop.f32.mrf.mxu0  ;;  %v51_v8 = vpop.f32.mrf.mxu1 }
  0x87   :  { %v49_v9 = vadd.f32 %v67_v6, %v48_v7  ;;  %v52_v10 = vadd.f32 %v67_v6, %v51_v8 }
  0x89   :  { %55 = vst.msk [vmem:[%s118_s3] sm:$0xff] %vm54_vm1, %v49_v9 }
  0x8a   :  { %56 = vst.msk [vmem:[%s118_s3 + $0x8] sm:$0xff] %vm54_vm1, %v52_v10 }

// kernel: decoder_layer.8
= control target key start
LH: loop header
LB: loop body
LE: loop exit
PB: predicated region body
PF: predicated region fallthrough
CT: control target
= control target key end

     0   :  { %vm24_vm0 = vcmask 261120   ;;  %s114_s1 = inlined_call_operand.vmem [shape: f32[32,32], index: 1, kind: input, shape index: {}]   ;;  %s115_s2 = inlined_call_operand.vmem [shape: f32[1,32], index: 2, kind: input, shape index: {}]   ;;  %s116_s0 = inlined_call_operand.vmem [shape: f32[16,32], index: 0, kind: input, shape index: {}]   ;;  %s117_s3 = inlined_call_operand.vmem [shape: f32[16,32], index: 3, kind: output, shape index: {}]  }
   0x1   :  { %v19_v0 = vld [vmem:[%s114_s1 + $0x18] sm:$0xff]  ;;  %v18_v1 = vld [vmem:[%s114_s1 + $0x10] sm:$0xff]  ;;  %v17_v2 = vld [vmem:[%s114_s1 + $0x8] sm:$0xff] }
   0x2   :  { %43 = vmatpush.msra.mxu0 %v19_v0  ;;  %62 = vmatpush.msra.mxu1 %v19_v0  ;;  %v16_v3 = vld [vmem:[%s114_s1] sm:$0xff]  ;;  %v15_v5 = vld [vmem:[%s116_s0 + $0x8] sm:$0xff] }
   0x3   :  { %v14_v4 = vld [vmem:[%s116_s0] sm:$0xff] }
   0x4   :  { %44 = vmatpush.msra.mxu0 %v18_v1  ;;  %63 = vmatpush.msra.mxu1 %v18_v1  ;;  %v66_v6 = vld [vmem:[%s115_s2] ss:$0 sm:$0xff] }
   0x6   :  { %45 = vmatpush.msra.mxu0 %v17_v2  ;;  %64 = vmatpush.msra.mxu1 %v17_v2 }
   0x8   :  { %46 = vmatpush.msra.mxu0 %v16_v3  ;;  %65 = vmatpush.msra.mxu1 %v16_v3 }
   0x9   :  { %60 = vmatmul.msk.f32.vlgmr.msra.gmra.mxu0 %vm24_vm0, %v14_v4  ;;  %61 = vmatmul.msk.f32.vlgmr.msra.gmra.mxu1 %vm24_vm0, %v15_v5 }
  0x86   :  { %v48_v7 = vpop.f32.mrf.mxu0  ;;  %v51_v8 = vpop.f32.mrf.mxu1 }
  0x87   :  { %v49_v9 = vadd.f32 %v66_v6, %v48_v7  ;;  %v52_v10 = vadd.f32 %v66_v6, %v51_v8 }
  0x89   :  { %54 = vst.msk [vmem:[%s117_s3] sm:$0xff] %vm24_vm0, %v49_v9 }
  0x8a   :  { %55 = vst.msk [vmem:[%s117_s3 + $0x8] sm:$0xff] %vm24_vm0, %v52_v10 }

// kernel: decoder_layer.7
= control target key start
LH: loop header
LB: loop body
LE: loop exit
PB: predicated region body
PF: predicated region fallthrough
CT: control target
= control target key end

     0   :  { %s1066_s30 = smov 0   ;;  %s1161_s0 = inlined_call_operand.vmem [shape: f32[2,4,8,8], index: 0, kind: input, shape index: {}]   ;;  %s1162_s1 = inlined_call_operand.vmem [shape: f32[2,4,8,8], index: 1, kind: input, shape index: {}]   ;;  %s1163_s2 = inlined_call_operand.vmem [shape: f32[2,4,8,8], index: 2, kind: input, shape index: {}]   ;;  %s1164_s3 = inlined_call_operand.vmem [shape: f32[2,8,8], index: 3, kind: input, shape index: {}]   ;;  %s1165_s4 = inlined_call_operand.vmem [shape: f32[4,8,32], index: 4, kind: input, shape index: {}]   ;;  %s1166_s5 = inlined_call_operand.vmem [shape: f32[1,32], index: 5, kind: input, shape index: {}]   ;;  %s1167_s6 = inlined_call_operand.vmem [shape: f32[2,8,32], index: 6, kind: input, shape index: {}]   ;;  %s1168_s7 = inlined_call_operand.vmem [shape: f32[1,32], index: 7, kind: input, shape index: {}]   ;;  %s1169_s8 = inlined_call_operand.vmem [shape: f32[1,32], index: 8, kind: input, shape index: {}]   ;;  %s1170_s9 = inlined_call_operand.vmem [shape: f32[2,8,32], index: 9, kind: output, shape index: {}]  }
   0x1 LB: > { %s938_s10 = sadd.s32 4294967295, %s1013_s30   ;;  %p942_p0 = scmp.ge.s32.totalorder %s1013_s30, 1  ;;  %s1013_s30 = sphi %s1066_s30, %s19_s30  }
   0x2   : > { %p325_p1 = scmp.lt.s32.totalorder %s1013_s30, 3 }
   0x4   : > { %p326_p2 = pnand %p942_p0, %p325_p1 }
   0x5   : > { %p378_p3 = scmp.lt.s32.totalorder (!%p326_p2), %s938_s10, 1 }
   0x6   : > { %329 = sbr.rel (%p326_p2) target bundleno = 973 (0x3cd), region = 56 }
   0xb   : > { %s1172_s10 = smov (!%p378_p3, %s938_s10), 1  ;;  %vm417_vm0 = vcmask 64512   ;;  %v670_v61 = vld [vmem:[%s1165_s4] sm:$0xff]  ;;  %v671_v62 = vld [vmem:[%s1165_s4 + $0x8] sm:$0xff]  ;;  %v672_v63 = vld [vmem:[%s1165_s4 + $0x10] sm:$0xff]  ;;  %vm766_vm2 = vcmask 261120  }
   0xc   : > { %s1074_s11 = sshll.u32 %s1172_s10, 5  ;;  %s1092_s18 = sshll.u32 %s1172_s10, 3 }
   0xd   : > { %s387_s14 = scalar_lea.vmem %s1162_s1, %s1074_s11  ;;  %s382_s17 = scalar_lea.vmem %s1161_s0, %s1074_s11 }
   0xe   : > { %v409_v0 = vld [vmem:[%s387_s14] sm:$0xff]  ;;  %v411_v1 = vld [vmem:[%s387_s14 + $0x10] sm:$0xff]  ;;  %v410_v4 = vld [vmem:[%s387_s14 + $0x8] sm:$0xff]  ;;  %s396_s21 = scalar_lea.vmem %s1164_s3, %s1092_s18  ;;  %s392_s24 = scalar_lea.vmem %s1163_s2, %s1074_s11 }
   0xf   : > { %v405_v2 = vld [vmem:[%s382_s17] sm:$0xff]  ;;  %952 = vmatpush.xpose.msk.msra.mxu0 %vm417_vm0, %v409_v0  ;;  %956 = vmatpush.xpose.msk.msra.mxu2 %vm417_vm0, %v411_v1  ;;  %v407_v3 = vld [vmem:[%s382_s17 + $0x10] sm:$0xff]  ;;  %v412_v5 = vld [vmem:[%s387_s14 + $0x18] sm:$0xff]  ;;  %s404_s25 = scalar_lea.vmem %s1170_s9, %s1092_s18 }
  0x10   : > { %954 = vmatpush.xpose.msk.msra.mxu1 %vm417_vm0, %v410_v4  ;;  %958 = vmatpush.xpose.msk.msra.mxu3 %vm417_vm0, %v412_v5  ;;  %v406_v6 = vld [vmem:[%s382_s17 + $0x8] sm:$0xff]  ;;  %v408_v7 = vld [vmem:[%s382_s17 + $0x18] sm:$0xff]  ;;  %v526_v8 = vld [vmem:[%s396_s21] sm:$0xff]  ;;  %s400_s17 = scalar_lea.vmem %s1167_s6, %s1092_s18 }
  0x11   : > { %vm527_vm1 = vcmp.eq.f32.partialorder %v526_v8, 0.0  ;;  %v413_v45 = vld [vmem:[%s392_s24] sm:$0xff]  ;;  %v415_v46 = vld [vmem:[%s392_s24 + $0x10] sm:$0xff]  ;;  %v416_v47 = vld [vmem:[%s392_s24 + $0x18] sm:$0xff] }
  0x12   : > { %953 = vmatmul.msk.f32.vlgmr.msra.gmra.mxu0 %vm417_vm0, %v405_v2  ;;  %957 = vmatmul.msk.f32.vlgmr.msra.gmra.mxu2 %vm417_vm0, %v407_v3  ;;  %v414_v48 = vld [vmem:[%s392_s24 + $0x8] sm:$0xff]  ;;  %v673_v0 = vld [vmem:[%s1165_s4 + $0x18] sm:$0xff] }
  0x13   : > { %955 = vmatmul.msk.f32.vlgmr.msra.gmra.mxu1 %vm417_vm0, %v406_v6  ;;  %959 = vmatmul.msk.f32.vlgmr.msra.gmra.mxu3 %vm417_vm0, %v408_v7 }
  0x14   : > { %596 = vmatpush.msrb.mxu0 %v413_v45  ;;  %642 = vmatpush.msrb.mxu2 %v415_v46 }
  0x15   : > { %665 = vmatpush.msrb.mxu3 %v416_v47  ;;  %619 = vmatpush.msrb.mxu1 %v414_v48 }
  0x16   : > { %692 = vmatpush.msra.mxu0 %v670_v61  ;;  %738 = vmatpush.msra.mxu2 %v672_v63 }
  0x17   : > { %715 = vmatpush.msra.mxu1 %v671_v62  ;;  %761 = vmatpush.msra.mxu3 %v673_v0 }
  0x8f   : > { %v441_v9 = vpop.f32.mrf.mxu0 }
  0x90   : > { %v522_v10 = vmul.f32 0.35355338, %v441_v9  ;;  %v467_v11 = vpop.f32.mrf.mxu1 }
  0x91   : > { %v523_v13 = vmul.f32 0.35355338, %v467_v11 }
  0x92   : > { %v530_v12 = vsel %vm527_vm1, -1e+10, %v522_v10 }
  0x93   : > { %v534_v14 = vsel %vm417_vm0, %v530_v12, -inf  ;;  %v531_v17 = vsel %vm527_vm1, -1e+10, %v523_v13 }
  0x94   : > { %535 = vmax.xlane.f32.xlu1 %v534_v14  ;;  %v537_v22 = vsel %vm417_vm0, %v531_v17, -inf  ;;  %v982_v14 = vld [vmem:[%s1166_s5] ss:$0 sm:$0xff] }
  0x95   : > { %v493_v15 = vpop.f32.mrf.mxu2 }
  0x96   : > { %v524_v16 = vmul.f32 0.35355338, %v493_v15  ;;  %v519_v18 = vpop.f32.mrf.mxu3 }
  0x97   : > { %v525_v20 = vmul.f32 0.35355338, %v519_v18 }
  0x98   : > { %v532_v19 = vsel %vm527_vm1, -1e+10, %v524_v16 }
  0x99   : > { %v540_v21 = vsel %vm417_vm0, %v532_v19, -inf  ;;  %v533_v23 = vsel %vm527_vm1, -1e+10, %v525_v20 }
  0x9a   : > { %541 = vmax.xlane.f32.xlu0 %v540_v21  ;;  %v543_v24 = vsel %vm417_vm0, %v533_v23, -inf  ;;  %v1015_v21 = vmov 32.0  }
  0x9c   : > { %538 = vmax.xlane.f32.xlu1 %v537_v22 }
  0xa2   : > { %544 = vmax.xlane.f32.xlu0 %v543_v24 }
 0x107   : > { %v536_v25 = vpop.xlane.xlu1 %535 }
 0x108   : > { %v546_v26 = vsub.f32 %v530_v12, %v536_v25 }
 0x10a   : > { %v550_v27 = vmul.f32 1.442695, %v546_v26 }
 0x10c   : > { %985 = vpow2.f32 %v550_v27 }
 0x10d   : > { %v542_v28 = vpop.xlane.xlu0 %541 }
 0x10e   : > { %v548_v29 = vsub.f32 %v532_v19, %v542_v28 }
 0x10f   : > { %v539_v30 = vpop.xlane.xlu1 %538 }
 0x110   : > { %v554_v31 = vmul.f32 1.442695, %v548_v29  ;;  %v547_v32 = vsub.f32 %v531_v17, %v539_v30  ;;  %v779_v17 = vld [vmem:[%s400_s17] sm:$0xff] }
 0x112   : > { %v986_v33 = vpop.eup %985  ;;  %987 = vpow2.f32 %v554_v31  ;;  %v552_v34 = vmul.f32 1.442695, %v547_v32 }
 0x113   : > { %v558_v35 = vsel %vm417_vm0, %v986_v33, 0.0 }
 0x114   : > { %989 = vpow2.f32 %v552_v34  ;;  %559 = vadd.xlane.f32.xlu0 %v558_v35 }
 0x115   : > { %v545_v36 = vpop.xlane.xlu0 %544 }
 0x116   : > { %v549_v37 = vsub.f32 %v533_v23, %v545_v36 }
 0x118   : > { %v988_v38 = vpop.eup %987  ;;  %v556_v39 = vmul.f32 1.442695, %v549_v37 }
 0x119   : > { %v564_v40 = vsel %vm417_vm0, %v988_v38, 0.0 }
 0x11a   : > { %v990_v41 = vpop.eup %989  ;;  %991 = vpow2.f32 %v556_v39  ;;  %565 = vadd.xlane.f32.xlu2 %v564_v40 }
 0x11b   : > { %v561_v42 = vsel %vm417_vm0, %v990_v41, 0.0 }
 0x11c   : > { %562 = vadd.xlane.f32.xlu1 %v561_v42 }
 0x120   : > { %v992_v43 = vpop.eup %991 }
 0x121   : > { %v567_v44 = vsel %vm417_vm0, %v992_v43, 0.0 }
 0x122   : > { %568 = vadd.xlane.f32.xlu2 %v567_v44 }
 0x187   : > { %v560_v49 = vpop.xlane.xlu0 %559 }
 0x188   : > { %993 = vrcp.f32 %v560_v49 }
 0x18d   : > { %v566_v50 = vpop.xlane.xlu2 %565 }
 0x18e   : > { %v994_v51 = vpop.eup %993  ;;  %995 = vrcp.f32 %v566_v50  ;;  %v983_v50 = vld [vmem:[%s1168_s7] ss:$0 sm:$0xff] }
 0x18f   : > { %v563_v52 = vpop.xlane.xlu1 %562  ;;  %v574_v53 = vmul.f32 %v994_v51, %v986_v33 }
 0x190   : > { %997 = vrcp.f32 %v563_v52 }
 0x191   : > { %960 = vmatmul.msk.f32.vlgmr.msrb.gmra.mxu0 %vm417_vm0, %v574_v53 }
 0x194   : > { %v996_v54 = vpop.eup %995 }
 0x195   : > { %v569_v55 = vpop.xlane.xlu2 %568  ;;  %v576_v56 = vmul.f32 %v996_v54, %v988_v38 }
 0x196   : > { %v998_v57 = vpop.eup %997  ;;  %999 = vrcp.f32 %v569_v55 }
 0x197   : > { %v575_v58 = vmul.f32 %v998_v57, %v990_v41  ;;  %962 = vmatmul.msk.f32.vlgmr.msrb.gmra.mxu2 %vm417_vm0, %v576_v56  ;;  %1001 = vrcp.f32 %v1015_v21  ;;  %v984_v56 = vld [vmem:[%s1169_s8] ss:$0 sm:$0xff] }
 0x199   : > { %961 = vmatmul.msk.f32.vlgmr.msrb.gmra.mxu1 %vm417_vm0, %v575_v58 }
 0x19c   : > { %v1000_v59 = vpop.eup %999 }
 0x19d   : > { %v577_v60 = vmul.f32 %v1000_v59, %v992_v43  ;;  %v1002_v22 = vpop.eup %1001 }
 0x19e   : > { %v787_v23 = vmul.f32 32.0, %v1002_v22  ;;  %vm791_vm3 = vweird.f32 %v1002_v22 }
 0x19f   : > { %963 = vmatmul.msk.f32.vlgmr.msrb.gmra.mxu3 %vm417_vm0, %v577_v60 }
 0x1a0   : > { %v788_v24 = vsub.f32 1.0, %v787_v23 }
 0x1a2   : > { %v789_v25 = vmul.f32 %v1002_v22, %v788_v24 }
 0x1a4   : > { %v790_v26 = vadd.f32 %v1002_v22, %v789_v25 }
 0x1a6   : > { %v792_v27 = vsel %vm791_vm3, %v1002_v22, %v790_v26 }
 0x20e   : > { %v598_v1 = vpop.f32.mrf.mxu0 }
 0x20f   : > { %964 = vmatmul.msk.f32.vlgmr.msra.gmra.mxu0 %vm417_vm0, %v598_v1 }
 0x216   : > { %v621_v2 = vpop.f32.mrf.mxu1 }
 0x217   : > { %965 = vmatmul.msk.f32.vlgmr.msra.gmra.mxu1 %vm417_vm0, %v621_v2 }
 0x21a   : > { %v644_v3 = vpop.f32.mrf.mxu2 }
 0x21b   : > { %966 = vmatmul.msk.f32.vlgmr.msra.gmra.mxu2 %vm417_vm0, %v644_v3 }
 0x222   : > { %v667_v4 = vpop.f32.mrf.mxu3 }
 0x223   : > { %967 = vmatmul.msk.f32.vlgmr.msra.gmra.mxu3 %vm417_vm0, %v667_v4 }
 0x28c   : > { %v694_v6 = vpop.f32.mrf.mxu0 }
 0x28d   : > { %v767_v9 = vsel %vm766_vm2, %v694_v6, 0.0 }
 0x294   : > { %v717_v5 = vpop.f32.mrf.mxu1 }
 0x295   : > { %v768_v8 = vsel %vm766_vm2, %v717_v5, 0.0 }
 0x296   : > { %v769_v11 = vadd.f32 %v768_v8, %v767_v9 }
 0x29e   : > { %v740_v7 = vpop.f32.mrf.mxu2 }
 0x29f   : > { %v770_v10 = vsel %vm766_vm2, %v740_v7, 0.0 }
 0x2a0   : > { %v771_v12 = vadd.f32 %v770_v10, %v769_v11 }
 0x2a6   : > { %v763_v13 = vpop.f32.mrf.mxu3 }
 0x2a7   : > { %v772_v15 = vsel %vm766_vm2, %v763_v13, 0.0 }
 0x2a8   : > { %v773_v16 = vadd.f32 %v772_v15, %v771_v12 }
 0x2aa   : > { %v778_v18 = vadd.f32 %v982_v14, %v773_v16 }
 0x2ac   : > { %v780_v19 = vadd.f32 %v779_v17, %v778_v18 }
 0x2ae   : > { %v783_v20 = vsel %vm766_vm2, %v780_v19, 0.0 }
 0x2af   : > { %784 = vadd.xlane.f32.xlu2 %v783_v20 }
 0x322   : > { %v785_v28 = vpop.xlane.xlu2 %784 }
 0x323   : > { %v793_v29 = vmul.f32 %v792_v27, %v785_v28 }
 0x325   : > { %v794_v30 = vsub.f32 %v780_v19, %v793_v29 }
 0x327   : > { %v795_v31 = vmul.f32 %v794_v30, %v794_v30  ;;  %v815_v55 = vmul.f32 %v983_v50, %v794_v30 }
 0x329   : > { %v796_v32 = vsel %vm766_vm2, %v795_v31, 0.0 }
 0x32a   : > { %797 = vadd.xlane.f32.xlu0 %v796_v32 }
 0x39d   : > { %v798_v33 = vpop.xlane.xlu0 %797 }
 0x39e   : > { %v799_v34 = vmul.f32 0.032258064, %v798_v33 }
 0x3a0   : > { %1003 = vrsqrt.f32 %v799_v34  ;;  %vm807_vm4 = vcmp.eq.f32.partialorder %v799_v34, inf  ;;  %v810_v42 = vand.u32 2147483648, %v799_v34  ;;  %vm809_vm5 = vcmp.eq.f32.partialorder %v799_v34, 0.0 }
 0x3a6   : > { %v1004_v35 = vpop.eup %1003 }
 0x3a7   : > { %v801_v36 = vmul.f32 %v1004_v35, %v799_v34 }
 0x3a9   : > { %v802_v37 = vmul.f32 %v1004_v35, %v801_v36 }
 0x3ab   : > { %v803_v38 = vmul.f32 0.5, %v802_v37 }
 0x3ad   : > { %v804_v39 = vsub.f32 1.5, %v803_v38 }
 0x3af   : > { %v805_v40 = vmul.f32 %v1004_v35, %v804_v39 }
 0x3b1   : > { %v806_v41 = vmul.f32 %v805_v40, %v799_v34 }
 0x3b3   : > { %v808_v43 = vsel %vm807_vm4, %v799_v34, %v806_v41 }
 0x3b4   : > { %v811_v44 = vsel %vm809_vm5, %v810_v42, %v808_v43 }
 0x3b5   : > { %v816_v45 = vadd.f32 1e-06, %v811_v44 }
 0x3b7   : > { %1005 = vrcp.f32 %v816_v45  ;;  %v828_v49 = vand.u32 2147483648, %v816_v45  ;;  %v826_v52 = vand.u32 2147483647, %v816_v45  ;;  %vm822_vm7 = vweird.f32 %v816_v45 }
 0x3b9   : > { %v829_v54 = vor.u32 1.1754944e-38, %v828_v49  ;;  %vm827_vm9 = vcmp.eq.f32.partialorder %v826_v52, 8.507059e+37 }
 0x3bd   : > { %v1006_v46 = vpop.eup %1005 }
 0x3be   : > { %v818_v47 = vmul.f32 %v1006_v46, %v816_v45  ;;  %vm823_vm6 = vweird.f32 %v1006_v46 }
 0x3bf   : > { %vm824_vm8 = vmor %vm822_vm7, %vm823_vm6 }
 0x3c0   : > { %v819_v48 = vsub.f32 1.0, %v818_v47 }
 0x3c2   : > { %v820_v51 = vmul.f32 %v1006_v46, %v819_v48 }
 0x3c4   : > { %v821_v53 = vadd.f32 %v1006_v46, %v820_v51 }
 0x3c6   : > { %v825_v57 = vsel %vm824_vm8, %v1006_v46, %v821_v53 }
 0x3c7   : > { %v830_v58 = vsel %vm827_vm9, %v829_v54, %v825_v57 }
 0x3c8   : > { %v831_v59 = vmul.f32 %v830_v58, %v815_v55 }
 0x3ca   : > { %v835_v60 = vadd.f32 %v984_v56, %v831_v59 }
 0x3cc   : > { %836 = vst.msk [vmem:[%s404_s25] sm:$0xff] %vm766_vm2, %v835_v60 }
 0x3cd PF: > { %s19_s30 = sadd.s32 1, %s1013_s30  }
 0x3ce   : > { %p16_p4 = scmp.ge.s32.totalorder %s19_s30, 4  }
 0x3d0   :  { %18 = sbr.rel (!%p16_p4) target bundleno = 1 (0x1), region = 98 }

// kernel: decoder_layer.11
= control target key start
LH: loop header
LB: loop body
LE: loop exit
PB: predicated region body
PF: predicated region fallthrough
CT: control target
= control target key end

     0   :  { %vm129_vm0 = vcmask 261120   ;;  %s2515_s0 = inlined_call_operand.vmem [shape: f32[16,32], index: 0, kind: input, shape index: {}]   ;;  %s2516_s1 = inlined_call_operand.vmem [shape: f32[32,2048], index: 1, kind: input, shape index: {}]   ;;  %s2517_s2 = inlined_call_operand.vmem [shape: f32[1,2048], index: 2, kind: input, shape index: {}]   ;;  %s2518_s3 = inlined_call_operand.vmem [shape: f32[2048,32], index: 3, kind: input, shape index: {}]   ;;  %s2519_s4 = inlined_call_operand.vmem [shape: f32[1,32], index: 4, kind: input, shape index: {}]   ;;  %s2520_s5 = inlined_call_operand.vmem [shape: f32[1,32], index: 5, kind: input, shape index: {}]   ;;  %s2521_s6 = inlined_call_operand.vmem [shape: f32[1,32], index: 6, kind: input, shape index: {}]   ;;  %s2522_s7 = inlined_call_operand.hbm [shape: f32[16,32], index: 7, kind: output, shape index: {}]  }
   0x1   :  { %v77_v0 = vld [vmem:[%s2516_s1 + $0x180] sm:$0xff]  ;;  %v79_v1 = vld [vmem:[%s2516_s1 + $0x190] sm:$0xff]  ;;  %v78_v3 = vld [vmem:[%s2516_s1 + $0x188] sm:$0xff] }
   0x2   :  { %v61_v2 = vld [vmem:[%s2516_s1 + $0x100] sm:$0xff]  ;;  %148 = vmatpush.msra.mxu0 %v77_v0  ;;  %194 = vmatpush.msra.mxu2 %v79_v1  ;;  %v63_v4 = vld [vmem:[%s2516_s1 + $0x110] sm:$0xff]  ;;  %v80_v5 = vld [vmem:[%s2516_s1 + $0x198] sm:$0xff] }
   0x3   :  { %171 = vmatpush.msra.mxu1 %v78_v3  ;;  %217 = vmatpush.msra.mxu3 %v80_v5  ;;  %v45_v6 = vld [vmem:[%s2516_s1 + $0x80] sm:$0xff]  ;;  %v62_v7 = vld [vmem:[%s2516_s1 + $0x108] sm:$0xff]  ;;  %v47_v8 = vld [vmem:[%s2516_s1 + $0x90] sm:$0xff] }
   0x4   :  { %149 = vmatpush.msra.mxu0 %v61_v2  ;;  %195 = vmatpush.msra.mxu2 %v63_v4  ;;  %v64_v9 = vld [vmem:[%s2516_s1 + $0x118] sm:$0xff]  ;;  %v46_v10 = vld [vmem:[%s2516_s1 + $0x88] sm:$0xff]  ;;  %v29_v11 = vld [vmem:[%s2516_s1] sm:$0xff] }
   0x5   :  { %172 = vmatpush.msra.mxu1 %v62_v7  ;;  %218 = vmatpush.msra.mxu3 %v64_v9  ;;  %v31_v12 = vld [vmem:[%s2516_s1 + $0x10] sm:$0xff]  ;;  %v48_v13 = vld [vmem:[%s2516_s1 + $0x98] sm:$0xff]  ;;  %v1447_v14 = vld [vmem:[%s2515_s0] sm:$0xff] }
   0x6   :  { %150 = vmatpush.msra.mxu0 %v45_v6  ;;  %196 = vmatpush.msra.mxu2 %v47_v8  ;;  %v30_v15 = vld [vmem:[%s2516_s1 + $0x8] sm:$0xff]  ;;  %v32_v16 = vld [vmem:[%s2516_s1 + $0x18] sm:$0xff]  ;;  %v81_v17 = vld [vmem:[%s2516_s1 + $0x1a0] sm:$0xff] }
   0x7   :  { %173 = vmatpush.msra.mxu1 %v46_v10  ;;  %219 = vmatpush.msra.mxu3 %v48_v13  ;;  %v83_v18 = vld [vmem:[%s2516_s1 + $0x1b0] sm:$0xff]  ;;  %v82_v19 = vld [vmem:[%s2516_s1 + $0x1a8] sm:$0xff]  ;;  %v84_v20 = vld [vmem:[%s2516_s1 + $0x1b8] sm:$0xff] }
   0x8   :  { %151 = vmatpush.msra.mxu0 %v29_v11  ;;  %197 = vmatpush.msra.mxu2 %v31_v12  ;;  %v65_v21 = vld [vmem:[%s2516_s1 + $0x120] sm:$0xff]  ;;  %v67_v22 = vld [vmem:[%s2516_s1 + $0x130] sm:$0xff]  ;;  %v66_v23 = vld [vmem:[%s2516_s1 + $0x128] sm:$0xff] }
   0x9   :  { %1281 = vmatmul.msk.f32.vlgmr.msra.gmra.mxu0 %vm129_vm0, %v1447_v14  ;;  %1285 = vmatmul.msk.f32.vlgmr.msra.gmra.mxu2 %vm129_vm0, %v1447_v14  ;;  %v68_v24 = vld [vmem:[%s2516_s1 + $0x138] sm:$0xff]  ;;  %v49_v25 = vld [vmem:[%s2516_s1 + $0xa0] sm:$0xff]  ;;  %v51_v26 = vld [vmem:[%s2516_s1 + $0xb0] sm:$0xff] }
   0xa   :  { %174 = vmatpush.msra.mxu1 %v30_v15  ;;  %220 = vmatpush.msra.mxu3 %v32_v16  ;;  %v1496_v27 = vld [vmem:[%s2515_s0 + $0x8] sm:$0xff]  ;;  %v33_v28 = vld [vmem:[%s2516_s1 + $0x20] sm:$0xff]  ;;  %v35_v30 = vld [vmem:[%s2516_s1 + $0x30] sm:$0xff] }
   0xb   :  { %1283 = vmatmul.msk.f32.vlgmr.msra.gmra.mxu1 %vm129_vm0, %v1447_v14  ;;  %1287 = vmatmul.msk.f32.vlgmr.msra.gmra.mxu3 %vm129_vm0, %v1447_v14  ;;  %v50_v29 = vld [vmem:[%s2516_s1 + $0xa8] sm:$0xff]  ;;  %v52_v31 = vld [vmem:[%s2516_s1 + $0xb8] sm:$0xff]  ;;  %v85_v33 = vld [vmem:[%s2516_s1 + $0x1c0] sm:$0xff] }
   0xc   :  { %240 = vmatpush.msrb.mxu0 %v81_v17  ;;  %286 = vmatpush.msrb.mxu2 %v83_v18  ;;  %v34_v32 = vld [vmem:[%s2516_s1 + $0x28] sm:$0xff] }
   0xd   :  { %263 = vmatpush.msrb.mxu1 %v82_v19  ;;  %309 = vmatpush.msrb.mxu3 %v84_v20 }
   0xe   :  { %241 = vmatpush.msrb.mxu0 %v65_v21  ;;  %287 = vmatpush.msrb.mxu2 %v67_v22 }
   0xf   :  { %264 = vmatpush.msrb.mxu1 %v66_v23  ;;  %310 = vmatpush.msrb.mxu3 %v68_v24 }
  0x10   :  { %242 = vmatpush.msrb.mxu0 %v49_v25  ;;  %288 = vmatpush.msrb.mxu2 %v51_v26 }
  0x11   :  { %1282 = vmatmul.msk.f32.gmra.mxu0 %vm129_vm0, %v1496_v27  ;;  %1286 = vmatmul.msk.f32.gmra.mxu2 %vm129_vm0, %v1496_v27 }
  0x12   :  { %243 = vmatpush.msrb.mxu0 %v33_v28  ;;  %265 = vmatpush.msrb.mxu1 %v50_v29 }
  0x13   :  { %12 = vsyncpa [#allocation3], 0  ;;  %1284 = vmatmul.msk.f32.gmra.mxu1 %vm129_vm0, %v1496_v27  ;;  %1288 = vmatmul.msk.f32.gmra.mxu3 %vm129_vm0, %v1496_v27  ;;  %v36_v34 = vld [vmem:[%s2516_s1 + $0x38] sm:$0xff]  ;;  %v87_v35 = vld [vmem:[%s2516_s1 + $0x1d0] sm:$0xff]  ;;  %s1269_s30 = sshll.u32 %s2522_s7, 4  ;;  %s1360_s8 = smov 128   ;;  %s1270_s30 = int_to_ptr.hbm [resolvable:$true] %s1269_s30 }
  0x14   :  { %289 = vmatpush.msrb.mxu2 %v35_v30  ;;  %311 = vmatpush.msrb.mxu3 %v52_v31  ;;  %v69_v36 = vld [vmem:[%s2516_s1 + $0x140] sm:$0xff]  ;;  %v86_v37 = vld [vmem:[%s2516_s1 + $0x1c8] sm:$0xff]  ;;  %v71_v38 = vld [vmem:[%s2516_s1 + $0x150] sm:$0xff]  ;;  %s1361_s9 = smov 8  }
  0x15   :  { %266 = vmatpush.msrb.mxu1 %v34_v32  ;;  %332 = vmatpush.msra.mxu0 %v85_v33  ;;  %v88_v39 = vld [vmem:[%s2516_s1 + $0x1d8] sm:$0xff]  ;;  %v53_v40 = vld [vmem:[%s2516_s1 + $0xc0] sm:$0xff]  ;;  %v70_v41 = vld [vmem:[%s2516_s1 + $0x148] sm:$0xff] }
  0x16   :  { %312 = vmatpush.msrb.mxu3 %v36_v34  ;;  %378 = vmatpush.msra.mxu2 %v87_v35  ;;  %v55_v42 = vld [vmem:[%s2516_s1 + $0xd0] sm:$0xff]  ;;  %v72_v43 = vld [vmem:[%s2516_s1 + $0x158] sm:$0xff]  ;;  %v37_v44 = vld [vmem:[%s2516_s1 + $0x40] sm:$0xff] }
  0x17   :  { %333 = vmatpush.msra.mxu0 %v69_v36  ;;  %355 = vmatpush.msra.mxu1 %v86_v37  ;;  %v54_v45 = vld [vmem:[%s2516_s1 + $0xc8] sm:$0xff]  ;;  %v39_v46 = vld [vmem:[%s2516_s1 + $0x50] sm:$0xff]  ;;  %v56_v47 = vld [vmem:[%s2516_s1 + $0xd8] sm:$0xff] }
  0x18   :  { %379 = vmatpush.msra.mxu2 %v71_v38  ;;  %401 = vmatpush.msra.mxu3 %v88_v39  ;;  %v38_v48 = vld [vmem:[%s2516_s1 + $0x48] sm:$0xff]  ;;  %v91_v49 = vld [vmem:[%s2516_s1 + $0x1f0] sm:$0xff]  ;;  %v40_v50 = vld [vmem:[%s2516_s1 + $0x58] sm:$0xff] }
  0x19   :  { %1289 = vmatmul.msk.f32.vlgmr.msrb.gmra.mxu0 %vm129_vm0, %v1447_v14  ;;  %1293 = vmatmul.msk.f32.vlgmr.msrb.gmra.mxu2 %vm129_vm0, %v1447_v14  ;;  %v89_v51 = vld [vmem:[%s2516_s1 + $0x1e0] sm:$0xff]  ;;  %v92_v52 = vld [vmem:[%s2516_s1 + $0x1f8] sm:$0xff]  ;;  %v75_v53 = vld [vmem:[%s2516_s1 + $0x170] sm:$0xff] }
  0x1a   :  { %334 = vmatpush.msra.mxu0 %v53_v40  ;;  %356 = vmatpush.msra.mxu1 %v70_v41  ;;  %v76_v54 = vld [vmem:[%s2516_s1 + $0x178] sm:$0xff]  ;;  %v59_v55 = vld [vmem:[%s2516_s1 + $0xf0] sm:$0xff]  ;;  %v90_v56 = vld [vmem:[%s2516_s1 + $0x1e8] sm:$0xff] }
  0x1b   :  { %1291 = vmatmul.msk.f32.vlgmr.msrb.gmra.mxu1 %vm129_vm0, %v1447_v14  ;;  %1295 = vmatmul.msk.f32.vlgmr.msrb.gmra.mxu3 %vm129_vm0, %v1447_v14  ;;  %v73_v57 = vld [vmem:[%s2516_s1 + $0x160] sm:$0xff]  ;;  %v60_v58 = vld [vmem:[%s2516_s1 + $0xf8] sm:$0xff]  ;;  %v43_v59 = vld [vmem:[%s2516_s1 + $0x70] sm:$0xff] }
  0x1c   :  { %380 = vmatpush.msra.mxu2 %v55_v42  ;;  %402 = vmatpush.msra.mxu3 %v72_v43  ;;  %v57_v60 = vld [vmem:[%s2516_s1 + $0xe0] sm:$0xff]  ;;  %v74_v61 = vld [vmem:[%s2516_s1 + $0x168] sm:$0xff]  ;;  %v44_v62 = vld [vmem:[%s2516_s1 + $0x78] sm:$0xff] }
  0x1d   :  { %335 = vmatpush.msra.mxu0 %v37_v44  ;;  %357 = vmatpush.msra.mxu1 %v54_v45  ;;  %v41_v63 = vld [vmem:[%s2516_s1 + $0x60] sm:$0xff]  ;;  %v58_v0 = vld [vmem:[%s2516_s1 + $0xe8] sm:$0xff]  ;;  %v551_v2 = vld [vmem:[%s2518_s3 + $0x78] sm:$0xff] }
  0x1e   :  { %381 = vmatpush.msra.mxu2 %v39_v46  ;;  %403 = vmatpush.msra.mxu3 %v56_v47  ;;  %v42_v1 = vld [vmem:[%s2516_s1 + $0x68] sm:$0xff]  ;;  %v567_v3 = vld [vmem:[%s2518_s3 + $0xf8] sm:$0xff]  ;;  %v550_v5 = vld [vmem:[%s2518_s3 + $0x70] sm:$0xff] }
  0x1f   :  { %358 = vmatpush.msra.mxu1 %v38_v48  ;;  %424 = vmatpush.msrb.mxu0 %v89_v51  ;;  %v583_v4 = vld [vmem:[%s2518_s3 + $0x178] sm:$0xff]  ;;  %v566_v7 = vld [vmem:[%s2518_s3 + $0xf0] sm:$0xff]  ;;  %v549_v9 = vld [vmem:[%s2518_s3 + $0x68] sm:$0xff] }
  0x20   :  { %470 = vmatpush.msrb.mxu2 %v91_v49  ;;  %404 = vmatpush.msra.mxu3 %v40_v50  ;;  %v599_v6 = vld [vmem:[%s2518_s3 + $0x1f8] sm:$0xff]  ;;  %v582_v8 = vld [vmem:[%s2518_s3 + $0x170] sm:$0xff]  ;;  %v548_v11 = vld [vmem:[%s2518_s3 + $0x60] sm:$0xff] }
  0x21   :  { %1290 = vmatmul.msk.f32.gmra.mxu0 %vm129_vm0, %v1496_v27  ;;  %1294 = vmatmul.msk.f32.gmra.mxu2 %vm129_vm0, %v1496_v27  ;;  %v598_v10 = vld [vmem:[%s2518_s3 + $0x1f0] sm:$0xff]  ;;  %v565_v12 = vld [vmem:[%s2518_s3 + $0xe8] sm:$0xff]  ;;  %v547_v13 = vld [vmem:[%s2518_s3 + $0x58] sm:$0xff] }
  0x22   :  { %493 = vmatpush.msrb.mxu3 %v92_v52  ;;  %471 = vmatpush.msrb.mxu2 %v75_v53  ;;  %v564_v15 = vld [vmem:[%s2518_s3 + $0xe0] sm:$0xff]  ;;  %v581_v16 = vld [vmem:[%s2518_s3 + $0x168] sm:$0xff]  ;;  %v546_v18 = vld [vmem:[%s2518_s3 + $0x50] sm:$0xff] }
  0x23   :  { %1292 = vmatmul.msk.f32.gmra.mxu1 %vm129_vm0, %v1496_v27  ;;  %1296 = vmatmul.msk.f32.gmra.mxu3 %vm129_vm0, %v1496_v27  ;;  %v597_v17 = vld [vmem:[%s2518_s3 + $0x1e8] sm:$0xff]  ;;  %v563_v19 = vld [vmem:[%s2518_s3 + $0xd8] sm:$0xff]  ;;  %v580_v20 = vld [vmem:[%s2518_s3 + $0x160] sm:$0xff] }
  0x24   :  { %494 = vmatpush.msrb.mxu3 %v76_v54  ;;  %472 = vmatpush.msrb.mxu2 %v59_v55  ;;  %v596_v21 = vld [vmem:[%s2518_s3 + $0x1e0] sm:$0xff]  ;;  %v545_v22 = vld [vmem:[%s2518_s3 + $0x48] sm:$0xff]  ;;  %v562_v23 = vld [vmem:[%s2518_s3 + $0xd0] sm:$0xff] }
  0x25   :  { %447 = vmatpush.msrb.mxu1 %v90_v56  ;;  %425 = vmatpush.msrb.mxu0 %v73_v57  ;;  %v544_v24 = vld [vmem:[%s2518_s3 + $0x40] sm:$0xff]  ;;  %v561_v25 = vld [vmem:[%s2518_s3 + $0xc8] sm:$0xff]  ;;  %v579_v26 = vld [vmem:[%s2518_s3 + $0x158] sm:$0xff] }
  0x26   :  { %495 = vmatpush.msrb.mxu3 %v60_v58  ;;  %473 = vmatpush.msrb.mxu2 %v43_v59  ;;  %v543_v28 = vld [vmem:[%s2518_s3 + $0x38] sm:$0xff]  ;;  %v560_v29 = vld [vmem:[%s2518_s3 + $0xc0] sm:$0xff]  ;;  %v578_v31 = vld [vmem:[%s2518_s3 + $0x150] sm:$0xff] }
  0x27   :  { %426 = vmatpush.msrb.mxu0 %v57_v60  ;;  %448 = vmatpush.msrb.mxu1 %v74_v61  ;;  %v595_v30 = vld [vmem:[%s2518_s3 + $0x1d8] sm:$0xff]  ;;  %v542_v32 = vld [vmem:[%s2518_s3 + $0x30] sm:$0xff]  ;;  %v541_v35 = vld [vmem:[%s2518_s3 + $0x28] sm:$0xff] }
  0x28   :  { %496 = vmatpush.msrb.mxu3 %v44_v62  ;;  %v559_v33 = vld [vmem:[%s2518_s3 + $0xb8] sm:$0xff]  ;;  %v594_v34 = vld [vmem:[%s2518_s3 + $0x1d0] sm:$0xff]  ;;  %v576_v37 = vld [vmem:[%s2518_s3 + $0x140] sm:$0xff] }
  0x29   :  { %1297 = vmatmul.msk.f32.vlgmr.msra.gmra.mxu0 %vm129_vm0, %v1447_v14  ;;  %1301 = vmatmul.msk.f32.vlgmr.msra.gmra.mxu2 %vm129_vm0, %v1447_v14  ;;  %v558_v36 = vld [vmem:[%s2518_s3 + $0xb0] sm:$0xff]  ;;  %v593_v38 = vld [vmem:[%s2518_s3 + $0x1c8] sm:$0xff]  ;;  %v540_v39 = vld [vmem:[%s2518_s3 + $0x20] sm:$0xff] }
  0x2a   :  { %427 = vmatpush.msrb.mxu0 %v41_v63  ;;  %449 = vmatpush.msrb.mxu1 %v58_v0  ;;  %v557_v40 = vld [vmem:[%s2518_s3 + $0xa8] sm:$0xff]  ;;  %v575_v41 = vld [vmem:[%s2518_s3 + $0x138] sm:$0xff]  ;;  %v592_v42 = vld [vmem:[%s2518_s3 + $0x1c0] sm:$0xff] }
  0x2b   :  { %1299 = vmatmul.msk.f32.vlgmr.msra.gmra.mxu1 %vm129_vm0, %v1447_v14  ;;  %1303 = vmatmul.msk.f32.vlgmr.msra.gmra.mxu3 %vm129_vm0, %v1447_v14  ;;  %v539_v43 = vld [vmem:[%s2518_s3 + $0x18] sm:$0xff]  ;;  %v556_v44 = vld [vmem:[%s2518_s3 + $0xa0] sm:$0xff]  ;;  %v574_v45 = vld [vmem:[%s2518_s3 + $0x130] sm:$0xff] }
  0x2c   :  { %450 = vmatpush.msrb.mxu1 %v42_v1  ;;  %796 = vmatpush.msra.mxu0 %v551_v2  ;;  %v538_v46 = vld [vmem:[%s2518_s3 + $0x10] sm:$0xff]  ;;  %v555_v47 = vld [vmem:[%s2518_s3 + $0x98] sm:$0xff]  ;;  %v573_v48 = vld [vmem:[%s2518_s3 + $0x128] sm:$0xff] }
  0x2d   :  { %842 = vmatpush.msra.mxu2 %v583_v4  ;;  %865 = vmatpush.msra.mxu3 %v599_v6  ;;  %v590_v49 = vld [vmem:[%s2518_s3 + $0x1b0] sm:$0xff]  ;;  %v537_v50 = vld [vmem:[%s2518_s3 + $0x8] sm:$0xff]  ;;  %v572_v52 = vld [vmem:[%s2518_s3 + $0x120] sm:$0xff] }
  0x2e   :  { %819 = vmatpush.msra.mxu1 %v567_v3  ;;  %797 = vmatpush.msra.mxu0 %v550_v5  ;;  %v554_v51 = vld [vmem:[%s2518_s3 + $0x90] sm:$0xff]  ;;  %v589_v53 = vld [vmem:[%s2518_s3 + $0x1a8] sm:$0xff]  ;;  %v536_v54 = vld [vmem:[%s2518_s3] sm:$0xff] }
  0x2f   :  { %843 = vmatpush.msra.mxu2 %v582_v8  ;;  %866 = vmatpush.msra.mxu3 %v598_v10  ;;  %v553_v55 = vld [vmem:[%s2518_s3 + $0x88] sm:$0xff]  ;;  %v571_v56 = vld [vmem:[%s2518_s3 + $0x118] sm:$0xff]  ;;  %v588_v57 = vld [vmem:[%s2518_s3 + $0x1a0] sm:$0xff] }
  0x30   :  { %820 = vmatpush.msra.mxu1 %v566_v7  ;;  %798 = vmatpush.msra.mxu0 %v549_v9  ;;  %v615_v58 = vld [vmem:[%s2518_s3 + $0x278] sm:$0xff]  ;;  %v552_v59 = vld [vmem:[%s2518_s3 + $0x80] sm:$0xff]  ;;  %v570_v60 = vld [vmem:[%s2518_s3 + $0x110] sm:$0xff] }
  0x31   :  { %1302 = vmatmul.msk.f32.gmra.mxu2 %vm129_vm0, %v1496_v27  ;;  %1298 = vmatmul.msk.f32.gmra.mxu0 %vm129_vm0, %v1496_v27  ;;  %v587_v61 = vld [vmem:[%s2518_s3 + $0x198] sm:$0xff]  ;;  %v614_v62 = vld [vmem:[%s2518_s3 + $0x270] sm:$0xff]  ;;  %v569_v0 = vld [vmem:[%s2518_s3 + $0x108] sm:$0xff] }
  0x32   :  { %799 = vmatpush.msra.mxu0 %v548_v11  ;;  %821 = vmatpush.msra.mxu1 %v565_v12  ;;  %v631_v63 = vld [vmem:[%s2518_s3 + $0x2f8] sm:$0xff]  ;;  %v586_v1 = vld [vmem:[%s2518_s3 + $0x190] sm:$0xff]  ;;  %v613_v2 = vld [vmem:[%s2518_s3 + $0x268] sm:$0xff] }
  0x33   :  { %1304 = vmatmul.msk.f32.gmra.mxu3 %vm129_vm0, %v1496_v27  ;;  %1300 = vmatmul.msk.f32.gmra.mxu1 %vm129_vm0, %v1496_v27  ;;  %v630_v3 = vld [vmem:[%s2518_s3 + $0x2f0] sm:$0xff]  ;;  %v568_v4 = vld [vmem:[%s2518_s3 + $0x100] sm:$0xff]  ;;  %v585_v5 = vld [vmem:[%s2518_s3 + $0x188] sm:$0xff] }
  0x34   :  { %800 = vmatpush.msra.mxu0 %v547_v13  ;;  %822 = vmatpush.msra.mxu1 %v564_v15  ;;  %v612_v6 = vld [vmem:[%s2518_s3 + $0x260] sm:$0xff]  ;;  %v629_v7 = vld [vmem:[%s2518_s3 + $0x2e8] sm:$0xff]  ;;  %v647_v8 = vld [vmem:[%s2518_s3 + $0x378] sm:$0xff] }
  0x35   :  { %844 = vmatpush.msra.mxu2 %v581_v16  ;;  %867 = vmatpush.msra.mxu3 %v597_v17  ;;  %v584_v9 = vld [vmem:[%s2518_s3 + $0x180] sm:$0xff]  ;;  %v611_v10 = vld [vmem:[%s2518_s3 + $0x258] sm:$0xff]  ;;  %v646_v12 = vld [vmem:[%s2518_s3 + $0x370] sm:$0xff] }
  0x36   :  { %801 = vmatpush.msra.mxu0 %v546_v18  ;;  %823 = vmatpush.msra.mxu1 %v563_v19  ;;  %v628_v11 = vld [vmem:[%s2518_s3 + $0x2e0] sm:$0xff]  ;;  %v663_v13 = vld [vmem:[%s2518_s3 + $0x3f8] sm:$0xff]  ;;  %v610_v15 = vld [vmem:[%s2518_s3 + $0x250] sm:$0xff] }
  0x37   :  { %845 = vmatpush.msra.mxu2 %v580_v20  ;;  %868 = vmatpush.msra.mxu3 %v596_v21  ;;  %v627_v16 = vld [vmem:[%s2518_s3 + $0x2d8] sm:$0xff]  ;;  %v645_v17 = vld [vmem:[%s2518_s3 + $0x368] sm:$0xff]  ;;  %v662_v18 = vld [vmem:[%s2518_s3 + $0x3f0] sm:$0xff] }
  0x38   :  { %802 = vmatpush.msra.mxu0 %v545_v22  ;;  %824 = vmatpush.msra.mxu1 %v562_v23  ;;  %v609_v19 = vld [vmem:[%s2518_s3 + $0x248] sm:$0xff]  ;;  %v626_v20 = vld [vmem:[%s2518_s3 + $0x2d0] sm:$0xff]  ;;  %v644_v21 = vld [vmem:[%s2518_s3 + $0x360] sm:$0xff] }
  0x39   :  { %1305 = vmatmul.msk.f32.vlgmr.msrb.gmra.mxu0 %vm129_vm0, %v1447_v14  ;;  %1309 = vmatmul.msk.f32.vlgmr.msrb.gmra.mxu2 %vm129_vm0, %v1447_v14  ;;  %v661_v22 = vld [vmem:[%s2518_s3 + $0x3e8] sm:$0xff]  ;;  %v608_v23 = vld [vmem:[%s2518_s3 + $0x240] sm:$0xff] }
  0x3a   :  { %803 = vmatpush.msra.mxu0 %v544_v24  ;;  %825 = vmatpush.msra.mxu1 %v561_v25  ;;  %v625_v24 = vld [vmem:[%s2518_s3 + $0x2c8] sm:$0xff]  ;;  %v643_v25 = vld [vmem:[%s2518_s3 + $0x358] sm:$0xff] }
  0x3b   :  { %1307 = vmatmul.msk.f32.vlgmr.msrb.gmra.mxu1 %vm129_vm0, %v1447_v14  ;;  %1311 = vmatmul.msk.f32.vlgmr.msrb.gmra.mxu3 %vm129_vm0, %v1447_v14  ;;  %v577_v14 = vld [vmem:[%s2518_s3 + $0x148] sm:$0xff] }
  0x3c   :  { %846 = vmatpush.msra.mxu2 %v579_v26  ;;  %804 = vmatpush.msra.mxu0 %v543_v28  ;;  %v660_v26 = vld [vmem:[%s2518_s3 + $0x3e0] sm:$0xff]  ;;  %v607_v28 = vld [vmem:[%s2518_s3 + $0x238] sm:$0xff] }
  0x3d   :  { %826 = vmatpush.msra.mxu1 %v560_v29  ;;  %869 = vmatpush.msra.mxu3 %v595_v30  ;;  %v624_v29 = vld [vmem:[%s2518_s3 + $0x2c0] sm:$0xff]  ;;  %v642_v30 = vld [vmem:[%s2518_s3 + $0x350] sm:$0xff] }
  0x3e   :  { %847 = vmatpush.msra.mxu2 %v578_v31  ;;  %805 = vmatpush.msra.mxu0 %v542_v32  ;;  %v659_v31 = vld [vmem:[%s2518_s3 + $0x3d8] sm:$0xff]  ;;  %v606_v32 = vld [vmem:[%s2518_s3 + $0x230] sm:$0xff] }
  0x3f   :  { %827 = vmatpush.msra.mxu1 %v559_v33  ;;  %870 = vmatpush.msra.mxu3 %v594_v34  ;;  %v623_v33 = vld [vmem:[%s2518_s3 + $0x2b8] sm:$0xff]  ;;  %v641_v34 = vld [vmem:[%s2518_s3 + $0x348] sm:$0xff] }
  0x40   :  { %848 = vmatpush.msra.mxu2 %v577_v14  ;;  %806 = vmatpush.msra.mxu0 %v541_v35  ;;  %v658_v14 = vld [vmem:[%s2518_s3 + $0x3d0] sm:$0xff]  ;;  %v605_v35 = vld [vmem:[%s2518_s3 + $0x228] sm:$0xff] }
  0x41   :  { %1306 = vmatmul.msk.f32.gmra.mxu0 %vm129_vm0, %v1496_v27  ;;  %1310 = vmatmul.msk.f32.gmra.mxu2 %vm129_vm0, %v1496_v27 }
  0x42   :  { %828 = vmatpush.msra.mxu1 %v558_v36  ;;  %849 = vmatpush.msra.mxu2 %v576_v37  ;;  %v622_v36 = vld [vmem:[%s2518_s3 + $0x2b0] sm:$0xff]  ;;  %v640_v37 = vld [vmem:[%s2518_s3 + $0x340] sm:$0xff] }
  0x43   :  { %1308 = vmatmul.msk.f32.gmra.mxu1 %vm129_vm0, %v1496_v27  ;;  %1312 = vmatmul.msk.f32.gmra.mxu3 %vm129_vm0, %v1496_v27  ;;  %v591_v27 = vld [vmem:[%s2518_s3 + $0x1b8] sm:$0xff] }
  0x44   :  { %871 = vmatpush.msra.mxu3 %v593_v38  ;;  %807 = vmatpush.msra.mxu0 %v540_v39  ;;  %v657_v38 = vld [vmem:[%s2518_s3 + $0x3c8] sm:$0xff]  ;;  %v604_v39 = vld [vmem:[%s2518_s3 + $0x220] sm:$0xff] }
  0x45   :  { %829 = vmatpush.msra.mxu1 %v557_v40  ;;  %850 = vmatpush.msra.mxu2 %v575_v41  ;;  %v621_v40 = vld [vmem:[%s2518_s3 + $0x2a8] sm:$0xff]  ;;  %v639_v41 = vld [vmem:[%s2518_s3 + $0x338] sm:$0xff] }
  0x46   :  { %872 = vmatpush.msra.mxu3 %v592_v42  ;;  %808 = vmatpush.msra.mxu0 %v539_v43  ;;  %v656_v42 = vld [vmem:[%s2518_s3 + $0x3c0] sm:$0xff]  ;;  %v603_v43 = vld [vmem:[%s2518_s3 + $0x218] sm:$0xff] }
  0x47   :  { %830 = vmatpush.msra.mxu1 %v556_v44  ;;  %851 = vmatpush.msra.mxu2 %v574_v45  ;;  %v620_v44 = vld [vmem:[%s2518_s3 + $0x2a0] sm:$0xff]  ;;  %v638_v45 = vld [vmem:[%s2518_s3 + $0x330] sm:$0xff] }
  0x48   :  { %873 = vmatpush.msra.mxu3 %v591_v27  ;;  %809 = vmatpush.msra.mxu0 %v538_v46  ;;  %v655_v27 = vld [vmem:[%s2518_s3 + $0x3b8] sm:$0xff]  ;;  %v602_v46 = vld [vmem:[%s2518_s3 + $0x210] sm:$0xff] }
  0x49   :  { %831 = vmatpush.msra.mxu1 %v555_v47  ;;  %852 = vmatpush.msra.mxu2 %v573_v48  ;;  %v619_v47 = vld [vmem:[%s2518_s3 + $0x298] sm:$0xff]  ;;  %v637_v48 = vld [vmem:[%s2518_s3 + $0x328] sm:$0xff] }
  0x4a   :  { %874 = vmatpush.msra.mxu3 %v590_v49  ;;  %810 = vmatpush.msra.mxu0 %v537_v50  ;;  %v654_v49 = vld [vmem:[%s2518_s3 + $0x3b0] sm:$0xff]  ;;  %v601_v50 = vld [vmem:[%s2518_s3 + $0x208] sm:$0xff] }
  0x4b   :  { %832 = vmatpush.msra.mxu1 %v554_v51  ;;  %853 = vmatpush.msra.mxu2 %v572_v52  ;;  %v618_v51 = vld [vmem:[%s2518_s3 + $0x290] sm:$0xff]  ;;  %v636_v52 = vld [vmem:[%s2518_s3 + $0x320] sm:$0xff] }
  0x4c   :  { %875 = vmatpush.msra.mxu3 %v589_v53  ;;  %811 = vmatpush.msra.mxu0 %v536_v54  ;;  %v653_v53 = vld [vmem:[%s2518_s3 + $0x3a8] sm:$0xff]  ;;  %v600_v54 = vld [vmem:[%s2518_s3 + $0x200] sm:$0xff] }
  0x4d   :  { %833 = vmatpush.msra.mxu1 %v553_v55  ;;  %854 = vmatpush.msra.mxu2 %v571_v56  ;;  %v617_v55 = vld [vmem:[%s2518_s3 + $0x288] sm:$0xff]  ;;  %v635_v56 = vld [vmem:[%s2518_s3 + $0x318] sm:$0xff] }
  0x4e   :  { %876 = vmatpush.msra.mxu3 %v588_v57  ;;  %888 = vmatpush.msrb.mxu0 %v615_v58  ;;  %v652_v57 = vld [vmem:[%s2518_s3 + $0x3a0] sm:$0xff] }
  0x4f   :  { %834 = vmatpush.msra.mxu1 %v552_v59  ;;  %855 = vmatpush.msra.mxu2 %v570_v60  ;;  %v616_v58 = vld [vmem:[%s2518_s3 + $0x280] sm:$0xff]  ;;  %v634_v59 = vld [vmem:[%s2518_s3 + $0x310] sm:$0xff]  ;;  %v651_v60 = vld [vmem:[%s2518_s3 + $0x398] sm:$0xff] }
  0x50   :  { %877 = vmatpush.msra.mxu3 %v587_v61  ;;  %889 = vmatpush.msrb.mxu0 %v614_v62  ;;  %v633_v61 = vld [vmem:[%s2518_s3 + $0x308] sm:$0xff]  ;;  %v650_v62 = vld [vmem:[%s2518_s3 + $0x390] sm:$0xff] }
  0x51   :  { %911 = vmatpush.msrb.mxu1 %v631_v63  ;;  %856 = vmatpush.msra.mxu2 %v569_v0  ;;  %v632_v63 = vld [vmem:[%s2518_s3 + $0x300] sm:$0xff]  ;;  %v649_v0 = vld [vmem:[%s2518_s3 + $0x388] sm:$0xff] }
  0x52   :  { %878 = vmatpush.msra.mxu3 %v586_v1  ;;  %890 = vmatpush.msrb.mxu0 %v613_v2  ;;  %v648_v1 = vld [vmem:[%s2518_s3 + $0x380] sm:$0xff] }
  0x53   :  { %912 = vmatpush.msrb.mxu1 %v630_v3  ;;  %857 = vmatpush.msra.mxu2 %v568_v4  ;;  %v2055_v2 = vld [vmem:[%s2517_s2] sm:$0xff] }
  0x54   :  { %879 = vmatpush.msra.mxu3 %v585_v5  ;;  %891 = vmatpush.msrb.mxu0 %v612_v6  ;;  %v97_v3 = vperm.slane %v2055_v2, 0  ;;  %v98_v4 = vperm.slane %v2055_v2, 1 }
  0x55   :  { %913 = vmatpush.msrb.mxu1 %v629_v7  ;;  %934 = vmatpush.msrb.mxu2 %v647_v8 }
  0x56   :  { %880 = vmatpush.msra.mxu3 %v584_v9  ;;  %892 = vmatpush.msrb.mxu0 %v611_v10  ;;  %v679_v10 = vld [vmem:[%s2518_s3 + $0x478] sm:$0xff] }
  0x57   :  { %914 = vmatpush.msrb.mxu1 %v628_v11  ;;  %935 = vmatpush.msrb.mxu2 %v646_v12  ;;  %v99_v11 = vperm.slane %v2055_v2, 2 }
  0x58   :  { %957 = vmatpush.msrb.mxu3 %v663_v13  ;;  %893 = vmatpush.msrb.mxu0 %v610_v15  ;;  %v678_v13 = vld [vmem:[%s2518_s3 + $0x470] sm:$0xff]  ;;  %v695_v15 = vld [vmem:[%s2518_s3 + $0x4f8] sm:$0xff] }
  0x59   :  { %915 = vmatpush.msrb.mxu1 %v627_v16  ;;  %936 = vmatpush.msrb.mxu2 %v645_v17  ;;  %v100_v16 = vperm.slane %v2055_v2, 3 }
  0x5a   :  { %958 = vmatpush.msrb.mxu3 %v662_v18  ;;  %894 = vmatpush.msrb.mxu0 %v609_v19  ;;  %v677_v19 = vld [vmem:[%s2518_s3 + $0x468] sm:$0xff] }
  0x5b   :  { %916 = vmatpush.msrb.mxu1 %v626_v20  ;;  %937 = vmatpush.msrb.mxu2 %v644_v21  ;;  %v694_v20 = vld [vmem:[%s2518_s3 + $0x4f0] sm:$0xff] }
  0x5c   :  { %959 = vmatpush.msrb.mxu3 %v661_v22  ;;  %895 = vmatpush.msrb.mxu0 %v608_v23 }
  0x5d   :  { %917 = vmatpush.msrb.mxu1 %v625_v24  ;;  %938 = vmatpush.msrb.mxu2 %v643_v25 }
  0x5e   :  { %960 = vmatpush.msrb.mxu3 %v660_v26  ;;  %896 = vmatpush.msrb.mxu0 %v607_v28  ;;  %v676_v26 = vld [vmem:[%s2518_s3 + $0x460] sm:$0xff]  ;;  %v693_v28 = vld [vmem:[%s2518_s3 + $0x4e8] sm:$0xff] }
  0x5f   :  { %918 = vmatpush.msrb.mxu1 %v624_v29  ;;  %939 = vmatpush.msrb.mxu2 %v642_v30  ;;  %v711_v30 = vld [vmem:[%s2518_s3 + $0x578] sm:$0xff] }
  0x60   :  { %961 = vmatpush.msrb.mxu3 %v659_v31  ;;  %897 = vmatpush.msrb.mxu0 %v606_v32 }
  0x61   :  { %919 = vmatpush.msrb.mxu1 %v623_v33  ;;  %940 = vmatpush.msrb.mxu2 %v641_v34  ;;  %v675_v34 = vld [vmem:[%s2518_s3 + $0x458] sm:$0xff] }
  0x62   :  { %962 = vmatpush.msrb.mxu3 %v658_v14  ;;  %898 = vmatpush.msrb.mxu0 %v605_v35  ;;  %v692_v14 = vld [vmem:[%s2518_s3 + $0x4e0] sm:$0xff]  ;;  %v710_v35 = vld [vmem:[%s2518_s3 + $0x570] sm:$0xff] }
  0x63   :  { %920 = vmatpush.msrb.mxu1 %v622_v36  ;;  %941 = vmatpush.msrb.mxu2 %v640_v37  ;;  %v727_v37 = vld [vmem:[%s2518_s3 + $0x5f8] sm:$0xff] }
  0x64   :  { %963 = vmatpush.msrb.mxu3 %v657_v38  ;;  %899 = vmatpush.msrb.mxu0 %v604_v39  ;;  %v101_v38 = vperm.slane %v2055_v2, 4 }
  0x65   :  { %921 = vmatpush.msrb.mxu1 %v621_v40  ;;  %942 = vmatpush.msrb.mxu2 %v639_v41  ;;  %v674_v40 = vld [vmem:[%s2518_s3 + $0x450] sm:$0xff]  ;;  %v691_v41 = vld [vmem:[%s2518_s3 + $0x4d8] sm:$0xff] }
  0x66   :  { %964 = vmatpush.msrb.mxu3 %v656_v42  ;;  %900 = vmatpush.msrb.mxu0 %v603_v43  ;;  %v709_v43 = vld [vmem:[%s2518_s3 + $0x568] sm:$0xff] }
  0x67   :  { %922 = vmatpush.msrb.mxu1 %v620_v44  ;;  %943 = vmatpush.msrb.mxu2 %v638_v45  ;;  %v726_v44 = vld [vmem:[%s2518_s3 + $0x5f0] sm:$0xff]  ;;  %v102_v45 = vperm.slane %v2055_v2, 5 }
  0x68   :  { %965 = vmatpush.msrb.mxu3 %v655_v27  ;;  %901 = vmatpush.msrb.mxu0 %v602_v46 }
  0x69   :  { %923 = vmatpush.msrb.mxu1 %v619_v47  ;;  %944 = vmatpush.msrb.mxu2 %v637_v48  ;;  %v673_v47 = vld [vmem:[%s2518_s3 + $0x448] sm:$0xff]  ;;  %v690_v48 = vld [vmem:[%s2518_s3 + $0x4d0] sm:$0xff] }
  0x6a   :  { %966 = vmatpush.msrb.mxu3 %v654_v49  ;;  %902 = vmatpush.msrb.mxu0 %v601_v50 }
  0x6b   :  { %924 = vmatpush.msrb.mxu1 %v618_v51  ;;  %945 = vmatpush.msrb.mxu2 %v636_v52  ;;  %v708_v52 = vld [vmem:[%s2518_s3 + $0x560] sm:$0xff] }
  0x6c   :  { %967 = vmatpush.msrb.mxu3 %v653_v53  ;;  %903 = vmatpush.msrb.mxu0 %v600_v54  ;;  %v725_v53 = vld [vmem:[%s2518_s3 + $0x5e8] sm:$0xff] }
  0x6d   :  { %925 = vmatpush.msrb.mxu1 %v617_v55  ;;  %946 = vmatpush.msrb.mxu2 %v635_v56  ;;  %v672_v55 = vld [vmem:[%s2518_s3 + $0x440] sm:$0xff] }
  0x6e   :  { %968 = vmatpush.msrb.mxu3 %v652_v57 }
  0x6f   :  { %926 = vmatpush.msrb.mxu1 %v616_v58  ;;  %947 = vmatpush.msrb.mxu2 %v634_v59  ;;  %v689_v58 = vld [vmem:[%s2518_s3 + $0x4c8] sm:$0xff]  ;;  %v707_v59 = vld [vmem:[%s2518_s3 + $0x558] sm:$0xff] }
  0x70   :  { %969 = vmatpush.msrb.mxu3 %v651_v60  ;;  %v103_v60 = vperm.slane %v2055_v2, 6 }
  0x71   :  { %948 = vmatpush.msrb.mxu2 %v633_v61 }
  0x72   :  { %970 = vmatpush.msrb.mxu3 %v650_v62  ;;  %v724_v62 = vld [vmem:[%s2518_s3 + $0x5e0] sm:$0xff] }
  0x73   :  { %949 = vmatpush.msrb.mxu2 %v632_v63  ;;  %v671_v63 = vld [vmem:[%s2518_s3 + $0x438] sm:$0xff] }
  0x74   :  { %971 = vmatpush.msrb.mxu3 %v649_v0 }
  0x76   :  { %972 = vmatpush.msrb.mxu3 %v648_v1  ;;  %v688_v1 = vld [vmem:[%s2518_s3 + $0x4c0] sm:$0xff] }
  0x86   :  { %v153_v5 = vpop.f32.mrf.mxu0 }
  0x87   :  { %v154_v6 = vadd.f32 %v153_v5, %v97_v3  ;;  %v104_v5 = vperm.slane %v2055_v2, 7  ;;  %v700_v2 = vld [vmem:[%s2518_s3 + $0x520] sm:$0xff] }
  0x88   :  { %v176_v7 = vpop.f32.mrf.mxu1 }
  0x89   :  { %v504_v8 = vmax.f32 %v154_v6, 0.0  ;;  %v177_v9 = vadd.f32 %v176_v7, %v98_v4  ;;  %v723_v6 = vld [vmem:[%s2518_s3 + $0x5d8] sm:$0xff] }
  0x8b   :  { %v505_v12 = vmax.f32 %v177_v9, 0.0  ;;  %812 = vmatmul.f32.vlgmr.msra.gmra.mxu0 %v504_v8  ;;  %v670_v8 = vld [vmem:[%s2518_s3 + $0x430] sm:$0xff]  ;;  %v687_v9 = vld [vmem:[%s2518_s3 + $0x4b8] sm:$0xff] }
  0x8c   :  { %980 = vmatpush.msra.mxu0 %v679_v10  ;;  %v199_v17 = vpop.f32.mrf.mxu2 }
  0x8d   :  { %v200_v18 = vadd.f32 %v199_v17, %v99_v11  ;;  %835 = vmatmul.f32.vlgmr.msra.gmra.mxu1 %v505_v12  ;;  %v705_v12 = vld [vmem:[%s2518_s3 + $0x548] sm:$0xff] }
  0x8e   :  { %981 = vmatpush.msra.mxu0 %v678_v13  ;;  %1003 = vmatpush.msra.mxu1 %v695_v15  ;;  %v156_v21 = vpop.f32.mrf.mxu0  ;;  %v222_v22 = vpop.f32.mrf.mxu3  ;;  %v722_v13 = vld [vmem:[%s2518_s3 + $0x5d0] sm:$0xff]  ;;  %v669_v17 = vld [vmem:[%s2518_s3 + $0x428] sm:$0xff] }
  0x8f   :  { %v506_v23 = vmax.f32 %v200_v18, 0.0  ;;  %v157_v24 = vadd.f32 %v156_v21, %v97_v3  ;;  %v223_v25 = vadd.f32 %v222_v22, %v100_v16  ;;  %v706_v3 = vld [vmem:[%s2518_s3 + $0x550] sm:$0xff]  ;;  %v704_v21 = vld [vmem:[%s2518_s3 + $0x540] sm:$0xff]  ;;  %v721_v22 = vld [vmem:[%s2518_s3 + $0x5c8] sm:$0xff] }
  0x90   :  { %982 = vmatpush.msra.mxu0 %v677_v19  ;;  %1004 = vmatpush.msra.mxu1 %v694_v20  ;;  %v179_v29 = vpop.f32.mrf.mxu1  ;;  %v686_v18 = vld [vmem:[%s2518_s3 + $0x4b0] sm:$0xff] }
  0x91   :  { %v520_v31 = vmax.f32 %v157_v24, 0.0  ;;  %v507_v32 = vmax.f32 %v223_v25, 0.0  ;;  %v180_v33 = vadd.f32 %v179_v29, %v98_v4  ;;  %858 = vmatmul.f32.vlgmr.msra.gmra.mxu2 %v506_v23  ;;  %v668_v24 = vld [vmem:[%s2518_s3 + $0x420] sm:$0xff]  ;;  %v2197_v29 = vld [vmem:[%s2517_s2 + $0x8] sm:$0xff] }
  0x92   :  { %983 = vmatpush.msra.mxu0 %v676_v26  ;;  %1005 = vmatpush.msra.mxu1 %v693_v28  ;;  %v685_v26 = vld [vmem:[%s2518_s3 + $0x4a8] sm:$0xff]  ;;  %v703_v28 = vld [vmem:[%s2518_s3 + $0x538] sm:$0xff] }
  0x93   :  { %v521_v36 = vmax.f32 %v180_v33, 0.0  ;;  %1026 = vmatpush.msra.mxu2 %v711_v30  ;;  %815 = vmatmul.f32.gmra.mxu0 %v520_v31  ;;  %v720_v31 = vld [vmem:[%s2518_s3 + $0x5c0] sm:$0xff]  ;;  %v667_v33 = vld [vmem:[%s2518_s3 + $0x418] sm:$0xff] }
  0x94   :  { %881 = vmatmul.f32.vlgmr.msra.gmra.mxu3 %v507_v32  ;;  %984 = vmatpush.msra.mxu0 %v675_v34  ;;  %v202_v39 = vpop.f32.mrf.mxu2 }
  0x95   :  { %1006 = vmatpush.msra.mxu1 %v692_v14  ;;  %1027 = vmatpush.msra.mxu2 %v710_v35  ;;  %v203_v42 = vadd.f32 %v202_v39, %v99_v11  ;;  %v684_v14 = vld [vmem:[%s2518_s3 + $0x4a0] sm:$0xff]  ;;  %v702_v35 = vld [vmem:[%s2518_s3 + $0x530] sm:$0xff] }
  0x96   :  { %1049 = vmatpush.msra.mxu3 %v727_v37  ;;  %838 = vmatmul.f32.gmra.mxu1 %v521_v36  ;;  %v225_v27 = vpop.f32.mrf.mxu3  ;;  %v245_v46 = vpop.f32.mrf.mxu0  ;;  %v105_v36 = vperm.slane %v2197_v29, 0  ;;  %v719_v37 = vld [vmem:[%s2518_s3 + $0x5b8] sm:$0xff] }
  0x97   :  { %v522_v49 = vmax.f32 %v203_v42, 0.0  ;;  %985 = vmatpush.msra.mxu0 %v674_v40  ;;  %1007 = vmatpush.msra.mxu1 %v691_v41  ;;  %v226_v50 = vadd.f32 %v225_v27, %v100_v16  ;;  %v246_v51 = vadd.f32 %v245_v46, %v101_v38  ;;  %v666_v41 = vld [vmem:[%s2518_s3 + $0x410] sm:$0xff]  ;;  %v683_v42 = vld [vmem:[%s2518_s3 + $0x498] sm:$0xff]  ;;  %v665_v46 = vld [vmem:[%s2518_s3 + $0x408] sm:$0xff] }
  0x98   :  { %1028 = vmatpush.msra.mxu2 %v709_v43  ;;  %1050 = vmatpush.msra.mxu3 %v726_v44  ;;  %v268_v54 = vpop.f32.mrf.mxu1  ;;  %v701_v43 = vld [vmem:[%s2518_s3 + $0x528] sm:$0xff]  ;;  %v718_v44 = vld [vmem:[%s2518_s3 + $0x5b0] sm:$0xff] }
  0x99   :  { %v508_v56 = vmax.f32 %v246_v51, 0.0  ;;  %986 = vmatpush.msra.mxu0 %v673_v47  ;;  %1008 = vmatpush.msra.mxu1 %v690_v48  ;;  %v269_v57 = vadd.f32 %v268_v54, %v102_v45  ;;  %v523_v61 = vmax.f32 %v226_v50, 0.0  ;;  %v682_v47 = vld [vmem:[%s2518_s3 + $0x490] sm:$0xff]  ;;  %v106_v48 = vperm.slane %v2197_v29, 1  ;;  %v717_v50 = vld [vmem:[%s2518_s3 + $0x5a8] sm:$0xff]  ;;  %v699_v54 = vld [vmem:[%s2518_s3 + $0x518] sm:$0xff] }
  0x9a   :  { %1029 = vmatpush.msra.mxu2 %v708_v52  ;;  %1051 = vmatpush.msra.mxu3 %v725_v53  ;;  %v664_v52 = vld [vmem:[%s2518_s3 + $0x400] sm:$0xff]  ;;  %v681_v53 = vld [vmem:[%s2518_s3 + $0x488] sm:$0xff] }
  0x9b   :  { %861 = vmatmul.f32.gmra.mxu2 %v522_v49  ;;  %987 = vmatpush.msra.mxu0 %v672_v55  ;;  %v509_v0 = vmax.f32 %v269_v57, 0.0 }
  0x9c   :  { %1009 = vmatpush.msra.mxu1 %v689_v58  ;;  %1030 = vmatpush.msra.mxu2 %v707_v59  ;;  %v291_v4 = vpop.f32.mrf.mxu2  ;;  %v716_v58 = vld [vmem:[%s2518_s3 + $0x5a0] sm:$0xff]  ;;  %v743_v59 = vld [vmem:[%s2518_s3 + $0x678] sm:$0xff] }
  0x9d   :  { %1052 = vmatpush.msra.mxu3 %v724_v62  ;;  %904 = vmatmul.f32.vlgmr.msrb.gmra.mxu0 %v508_v56  ;;  %v292_v7 = vadd.f32 %v291_v4, %v103_v60  ;;  %v680_v62 = vld [vmem:[%s2518_s3 + $0x480] sm:$0xff]  ;;  %v759_v4 = vld [vmem:[%s2518_s3 + $0x6f8] sm:$0xff] }
  0x9e   :  { %884 = vmatmul.f32.gmra.mxu3 %v523_v61  ;;  %988 = vmatpush.msra.mxu0 %v671_v63  ;;  %v248_v10 = vpop.f32.mrf.mxu0  ;;  %v314_v11 = vpop.f32.mrf.mxu3  ;;  %v698_v63 = vld [vmem:[%s2518_s3 + $0x510] sm:$0xff] }
  0x9f   :  { %1010 = vmatpush.msra.mxu1 %v688_v1  ;;  %1031 = vmatpush.msra.mxu2 %v706_v3  ;;  %v249_v15 = vadd.f32 %v248_v10, %v101_v38  ;;  %v315_v16 = vadd.f32 %v314_v11, %v104_v5  ;;  %v510_v20 = vmax.f32 %v292_v7, 0.0  ;;  %v742_v1 = vld [vmem:[%s2518_s3 + $0x670] sm:$0xff]  ;;  %v741_v10 = vld [vmem:[%s2518_s3 + $0x668] sm:$0xff] }
  0xa0   :  { %1053 = vmatpush.msra.mxu3 %v723_v6  ;;  %927 = vmatmul.f32.vlgmr.msrb.gmra.mxu1 %v509_v0  ;;  %v271_v19 = vpop.f32.mrf.mxu1  ;;  %v715_v0 = vld [vmem:[%s2518_s3 + $0x598] sm:$0xff]  ;;  %v108_v6 = vperm.slane %v2197_v29, 3  ;;  %v758_v11 = vld [vmem:[%s2518_s3 + $0x6f0] sm:$0xff] }
  0xa1   :  { %989 = vmatpush.msra.mxu0 %v670_v8  ;;  %1011 = vmatpush.msra.mxu1 %v687_v9  ;;  %v272_v23 = vadd.f32 %v271_v19, %v102_v45  ;;  %v524_v25 = vmax.f32 %v249_v15, 0.0  ;;  %v511_v30 = vmax.f32 %v315_v16, 0.0  ;;  %v714_v9 = vld [vmem:[%s2518_s3 + $0x590] sm:$0xff]  ;;  %v740_v16 = vld [vmem:[%s2518_s3 + $0x660] sm:$0xff]  ;;  %v775_v19 = vld [vmem:[%s2518_s3 + $0x778] sm:$0xff] }
  0xa2   :  { %1032 = vmatpush.msra.mxu2 %v705_v12  ;;  %1054 = vmatpush.msra.mxu3 %v722_v13  ;;  %v696_v12 = vld [vmem:[%s2518_s3 + $0x500] sm:$0xff]  ;;  %v713_v13 = vld [vmem:[%s2518_s3 + $0x588] sm:$0xff] }
  0xa3   :  { %990 = vmatpush.msra.mxu0 %v669_v17  ;;  %1012 = vmatpush.msra.mxu1 %v686_v18  ;;  %v525_v34 = vmax.f32 %v272_v23, 0.0  ;;  %v757_v17 = vld [vmem:[%s2518_s3 + $0x6e8] sm:$0xff]  ;;  %v774_v23 = vld [vmem:[%s2518_s3 + $0x770] sm:$0xff] }
  0xa4   :  { %1033 = vmatpush.msra.mxu2 %v704_v21  ;;  %1055 = vmatpush.msra.mxu3 %v721_v22  ;;  %v294_v32 = vpop.f32.mrf.mxu2  ;;  %v739_v21 = vld [vmem:[%s2518_s3 + $0x658] sm:$0xff]  ;;  %v756_v22 = vld [vmem:[%s2518_s3 + $0x6e0] sm:$0xff] }
  0xa5   :  { %950 = vmatmul.f32.vlgmr.msrb.gmra.mxu2 %v510_v20  ;;  %991 = vmatpush.msra.mxu0 %v668_v24  ;;  %v295_v38 = vadd.f32 %v294_v32, %v103_v60  ;;  %v107_v60 = vperm.slane %v2197_v29, 2  ;;  %v712_v20 = vld [vmem:[%s2518_s3 + $0x580] sm:$0xff] }
  0xa6   :  { %1013 = vmatpush.msra.mxu1 %v685_v26  ;;  %1034 = vmatpush.msra.mxu2 %v703_v28  ;;  %v317_v39 = vpop.f32.mrf.mxu3  ;;  %v337_v40 = vpop.f32.mrf.mxu0  ;;  %v791_v28 = vld [vmem:[%s2518_s3 + $0x7f8] sm:$0xff] }
  0xa7   :  { %1056 = vmatpush.msra.mxu3 %v720_v31  ;;  %907 = vmatmul.f32.gmra.mxu0 %v524_v25  ;;  %v318_v45 = vadd.f32 %v317_v39, %v104_v5  ;;  %v338_v27 = vadd.f32 %v337_v40, %v105_v36  ;;  %v526_v49 = vmax.f32 %v295_v38, 0.0  ;;  %v697_v5 = vld [vmem:[%s2518_s3 + $0x508] sm:$0xff]  ;;  %v755_v31 = vld [vmem:[%s2518_s3 + $0x6d8] sm:$0xff]  ;;  %v772_v39 = vld [vmem:[%s2518_s3 + $0x760] sm:$0xff] }
  0xa8   :  { %973 = vmatmul.f32.vlgmr.msrb.gmra.mxu3 %v511_v30  ;;  %992 = vmatpush.msra.mxu0 %v667_v33  ;;  %v360_v51 = vpop.f32.mrf.mxu1  ;;  %v738_v30 = vld [vmem:[%s2518_s3 + $0x650] sm:$0xff]  ;;  %v737_v38 = vld [vmem:[%s2518_s3 + $0x648] sm:$0xff] }
  0xa9   :  { %1014 = vmatpush.msra.mxu1 %v684_v14  ;;  %1035 = vmatpush.msra.mxu2 %v702_v35  ;;  %v527_v55 = vmax.f32 %v318_v45, 0.0  ;;  %v512_v56 = vmax.f32 %v338_v27, 0.0  ;;  %v361_v57 = vadd.f32 %v360_v51, %v106_v48  ;;  %v790_v14 = vld [vmem:[%s2518_s3 + $0x7f0] sm:$0xff]  ;;  %v789_v40 = vld [vmem:[%s2518_s3 + $0x7e8] sm:$0xff] }
  0xaa   :  { %1057 = vmatpush.msra.mxu3 %v719_v37  ;;  %930 = vmatmul.f32.gmra.mxu1 %v525_v34  ;;  %v773_v34 = vld [vmem:[%s2518_s3 + $0x768] sm:$0xff]  ;;  %v770_v51 = vld [vmem:[%s2518_s3 + $0x750] sm:$0xff] }
  0xab   :  { %993 = vmatpush.msra.mxu0 %v666_v41  ;;  %1015 = vmatpush.msra.mxu1 %v683_v42  ;;  %v513_v3 = vmax.f32 %v361_v57, 0.0  ;;  %v733_v57 = vld [vmem:[%s2518_s3 + $0x628] sm:$0xff] }
  0xac   :  { %1036 = vmatpush.msra.mxu2 %v701_v43  ;;  %1058 = vmatpush.msra.mxu3 %v718_v44  ;;  %v383_v61 = vpop.f32.mrf.mxu2  ;;  %v736_v43 = vld [vmem:[%s2518_s3 + $0x640] sm:$0xff]  ;;  %v753_v44 = vld [vmem:[%s2518_s3 + $0x6c8] sm:$0xff] }
  0xad   :  { %994 = vmatpush.msra.mxu0 %v665_v46  ;;  %1016 = vmatpush.msra.mxu1 %v682_v47  ;;  %v384_v8 = vadd.f32 %v383_v61, %v107_v60  ;;  %v771_v46 = vld [vmem:[%s2518_s3 + $0x758] sm:$0xff]  ;;  %v788_v47 = vld [vmem:[%s2518_s3 + $0x7e0] sm:$0xff] }
  0xae   :  { %1037 = vmatpush.msra.mxu2 %v700_v2  ;;  %1059 = vmatpush.msra.mxu3 %v717_v50  ;;  %v406_v7 = vpop.f32.mrf.mxu3  ;;  %v340_v24 = vpop.f32.mrf.mxu0  ;;  %v732_v61 = vld [vmem:[%s2518_s3 + $0x620] sm:$0xff] }
  0xaf   :  { %953 = vmatmul.f32.gmra.mxu2 %v526_v49  ;;  %995 = vmatpush.msra.mxu0 %v664_v52  ;;  %v407_v15 = vadd.f32 %v406_v7, %v108_v6  ;;  %v514_v18 = vmax.f32 %v384_v8, 0.0  ;;  %v341_v32 = vadd.f32 %v340_v24, %v105_v36  ;;  %v754_v36 = vld [vmem:[%s2518_s3 + $0x6d0] sm:$0xff]  ;;  %v752_v49 = vld [vmem:[%s2518_s3 + $0x6c0] sm:$0xff]  ;;  %v787_v52 = vld [vmem:[%s2518_s3 + $0x7d8] sm:$0xff] }
  0xb0   :  { %1017 = vmatpush.msra.mxu1 %v681_v53  ;;  %1038 = vmatpush.msra.mxu2 %v699_v54  ;;  %v363_v35 = vpop.f32.mrf.mxu1  ;;  %v734_v53 = vld [vmem:[%s2518_s3 + $0x630] sm:$0xff]  ;;  %v751_v54 = vld [vmem:[%s2518_s3 + $0x6b8] sm:$0xff]  ;;  %v745_v24 = vld [vmem:[%s2518_s3 + $0x688] sm:$0xff] }
  0xb1   :  { %1060 = vmatpush.msra.mxu3 %v716_v58  ;;  %1072 = vmatpush.msrb.mxu0 %v743_v59  ;;  %v515_v26 = vmax.f32 %v407_v15, 0.0  ;;  %v364_v41 = vadd.f32 %v363_v35, %v106_v48  ;;  %v528_v45 = vmax.f32 %v341_v32, 0.0  ;;  %v735_v48 = vld [vmem:[%s2518_s3 + $0x638] sm:$0xff]  ;;  %v750_v58 = vld [vmem:[%s2518_s3 + $0x6b0] sm:$0xff]  ;;  %v768_v59 = vld [vmem:[%s2518_s3 + $0x740] sm:$0xff] }
  0xb2   :  { %976 = vmatmul.f32.gmra.mxu3 %v527_v55  ;;  %996 = vmatmul.f32.vlgmr.msra.gmra.mxu0 %v512_v56  ;;  %v769_v55 = vld [vmem:[%s2518_s3 + $0x748] sm:$0xff]  ;;  %v786_v56 = vld [vmem:[%s2518_s3 + $0x7d0] sm:$0xff]  ;;  %v783_v8 = vld [vmem:[%s2518_s3 + $0x7b8] sm:$0xff] }
  0xb3   :  { %1018 = vmatpush.msra.mxu1 %v680_v62  ;;  %1039 = vmatpush.msra.mxu2 %v698_v63  ;;  %v529_v2 = vmax.f32 %v364_v41, 0.0  ;;  %v749_v62 = vld [vmem:[%s2518_s3 + $0x6a8] sm:$0xff]  ;;  %v766_v7 = vld [vmem:[%s2518_s3 + $0x730] sm:$0xff]  ;;  %v744_v32 = vld [vmem:[%s2518_s3 + $0x680] sm:$0xff] }
  0xb4   :  { %1061 = vmatpush.msra.mxu3 %v715_v0  ;;  %1073 = vmatpush.msrb.mxu0 %v742_v1  ;;  %v386_v25 = vpop.f32.mrf.mxu2  ;;  %v767_v0 = vld [vmem:[%s2518_s3 + $0x738] sm:$0xff]  ;;  %v784_v1 = vld [vmem:[%s2518_s3 + $0x7c0] sm:$0xff]  ;;  %v782_v15 = vld [vmem:[%s2518_s3 + $0x7b0] sm:$0xff] }
  0xb5   :  { %1095 = vmatpush.msrb.mxu1 %v759_v4  ;;  %1040 = vmatpush.msra.mxu2 %v697_v5  ;;  %v387_v33 = vadd.f32 %v386_v25, %v107_v60  ;;  %v785_v60 = vld [vmem:[%s2518_s3 + $0x7c8] sm:$0xff]  ;;  %v731_v4 = vld [vmem:[%s2518_s3 + $0x618] sm:$0xff]  ;;  %v748_v5 = vld [vmem:[%s2518_s3 + $0x6a0] sm:$0xff] }
  0xb6   :  { %1019 = vmatmul.f32.vlgmr.msra.gmra.mxu1 %v513_v3  ;;  %1062 = vmatpush.msra.mxu3 %v714_v9  ;;  %v409_v37 = vpop.f32.mrf.mxu3  ;;  %v429_v63 = vpop.f32.mrf.mxu0  ;;  %v109_v3 = vperm.slane %v2197_v29, 4  ;;  %v110_v9 = vperm.slane %v2197_v29, 5  ;;  %v762_v35 = vld [vmem:[%s2518_s3 + $0x710] sm:$0xff] }
  0xb7   :  { %1074 = vmatpush.msrb.mxu0 %v741_v10  ;;  %1096 = vmatpush.msrb.mxu1 %v758_v11  ;;  %v410_v42 = vadd.f32 %v409_v37, %v108_v6  ;;  %v530_v27 = vmax.f32 %v387_v33, 0.0  ;;  %v730_v10 = vld [vmem:[%s2518_s3 + $0x610] sm:$0xff]  ;;  %v747_v11 = vld [vmem:[%s2518_s3 + $0x698] sm:$0xff] }
  0xb8   :  { %1041 = vmatpush.msra.mxu2 %v696_v12  ;;  %1063 = vmatpush.msra.mxu3 %v713_v13  ;;  %v452_v6 = vpop.f32.mrf.mxu1  ;;  %v430_v12 = vadd.f32 %v429_v63, %v109_v3  ;;  %v765_v13 = vld [vmem:[%s2518_s3 + $0x728] sm:$0xff]  ;;  %v779_v37 = vld [vmem:[%s2518_s3 + $0x798] sm:$0xff] }
  0xb9   :  { %1075 = vmatpush.msrb.mxu0 %v740_v16  ;;  %1097 = vmatpush.msrb.mxu1 %v757_v17  ;;  %v531_v50 = vmax.f32 %v410_v42, 0.0  ;;  %v729_v16 = vld [vmem:[%s2518_s3 + $0x608] sm:$0xff]  ;;  %v746_v17 = vld [vmem:[%s2518_s3 + $0x690] sm:$0xff] }
  0xba   :  { %1118 = vmatpush.msrb.mxu2 %v775_v19  ;;  %1064 = vmatpush.msra.mxu3 %v712_v20  ;;  %v453_v19 = vadd.f32 %v452_v6, %v110_v9  ;;  %v764_v20 = vld [vmem:[%s2518_s3 + $0x720] sm:$0xff] }
  0xbb   :  { %1042 = vmatmul.f32.vlgmr.msra.gmra.mxu2 %v514_v18  ;;  %1076 = vmatpush.msrb.mxu0 %v739_v21  ;;  %v781_v21 = vld [vmem:[%s2518_s3 + $0x7a8] sm:$0xff] }
  0xbc   :  { %1098 = vmatpush.msrb.mxu1 %v756_v22  ;;  %1119 = vmatpush.msrb.mxu2 %v774_v23  ;;  %v475_v18 = vpop.f32.mrf.mxu2  ;;  %v111_v22 = vperm.slane %v2197_v29, 6  ;;  %v728_v23 = vld [vmem:[%s2518_s3 + $0x600] sm:$0xff] }
  0xbd   :  { %1141 = vmatpush.msrb.mxu3 %v791_v28  ;;  %1077 = vmatpush.msrb.mxu0 %v738_v30  ;;  %v763_v28 = vld [vmem:[%s2518_s3 + $0x718] sm:$0xff]  ;;  %v780_v30 = vld [vmem:[%s2518_s3 + $0x7a0] sm:$0xff] }
  0xbe   :  { %1065 = vmatmul.f32.vlgmr.msra.gmra.mxu3 %v515_v26  ;;  %1099 = vmatpush.msrb.mxu1 %v755_v31  ;;  %v498_v25 = vpop.f32.mrf.mxu3  ;;  %v516_v26 = vmax.f32 %v430_v12, 0.0  ;;  %v112_v31 = vperm.slane %v2197_v29, 7  ;;  %v432_v33 = vpop.f32.mrf.mxu0 }
  0xbf   :  { %1120 = vmatpush.msrb.mxu2 %v773_v34  ;;  %1142 = vmatpush.msrb.mxu3 %v790_v14  ;;  %v517_v34 = vmax.f32 %v453_v19, 0.0  ;;  %v476_v14 = vadd.f32 %v475_v18, %v111_v22 }
  0xc0   :  { %1078 = vmatpush.msrb.mxu0 %v737_v38  ;;  %1100 = vmatpush.msrb.mxu1 %v754_v36  ;;  %v455_v29 = vpop.f32.mrf.mxu1  ;;  %v433_v38 = vadd.f32 %v432_v33, %v109_v3  ;;  %v499_v36 = vadd.f32 %v498_v25, %v112_v31 }
  0xc1   :  { %1121 = vmatpush.msrb.mxu2 %v772_v39  ;;  %1143 = vmatpush.msrb.mxu3 %v789_v40  ;;  %v761_v39 = vld [vmem:[%s2518_s3 + $0x708] sm:$0xff]  ;;  %v778_v40 = vld [vmem:[%s2518_s3 + $0x790] sm:$0xff]  ;;  %v518_v41 = vmax.f32 %v476_v14, 0.0  ;;  %v456_v42 = vadd.f32 %v455_v29, %v110_v9 }
  0xc2   :  { %1079 = vmatpush.msrb.mxu0 %v736_v43  ;;  %1101 = vmatpush.msrb.mxu1 %v753_v44  ;;  %v760_v43 = vld [vmem:[%s2518_s3 + $0x700] sm:$0xff]  ;;  %v777_v44 = vld [vmem:[%s2518_s3 + $0x788] sm:$0xff] }
  0xc3   :  { %1122 = vmatpush.msrb.mxu2 %v771_v46  ;;  %1144 = vmatpush.msrb.mxu3 %v788_v47  ;;  %v519_v46 = vmax.f32 %v499_v36, 0.0  ;;  %v776_v47 = vld [vmem:[%s2518_s3 + $0x780] sm:$0xff] }
  0xc4   :  { %999 = vmatmul.f32.gmra.mxu0 %v528_v45  ;;  %1045 = vmatmul.f32.gmra.mxu2 %v530_v27  ;;  %v478_v45 = vpop.f32.mrf.mxu2  ;;  %v532_v27 = vmax.f32 %v433_v38, 0.0 }
  0xc5   :  { %1080 = vmatpush.msrb.mxu0 %v735_v48  ;;  %1102 = vmatpush.msrb.mxu1 %v752_v49  ;;  %v533_v49 = vmax.f32 %v456_v42, 0.0 }
  0xc6   :  { %1123 = vmatpush.msrb.mxu2 %v770_v51  ;;  %1145 = vmatpush.msrb.mxu3 %v787_v52  ;;  %v501_v48 = vpop.f32.mrf.mxu3 }
  0xc7   :  { %1022 = vmatmul.f32.gmra.mxu1 %v529_v2  ;;  %1068 = vmatmul.f32.gmra.mxu3 %v531_v50  ;;  %v479_v2 = vadd.f32 %v478_v45, %v111_v22  ;;  %v502_v50 = vadd.f32 %v501_v48, %v112_v31 }
  0xc8   :  { %1081 = vmatpush.msrb.mxu0 %v734_v53  ;;  %1103 = vmatpush.msrb.mxu1 %v751_v54 }
  0xc9   :  { %1124 = vmatpush.msrb.mxu2 %v769_v55  ;;  %1146 = vmatpush.msrb.mxu3 %v786_v56  ;;  %v534_v51 = vmax.f32 %v479_v2, 0.0  ;;  %v535_v52 = vmax.f32 %v502_v50, 0.0  ;;  %v1330_v2 = vld [vmem:[%s2515_s0] sm:$0xff] }
  0xca   :  { %1082 = vmatpush.msrb.mxu0 %v733_v57  ;;  %1104 = vmatpush.msrb.mxu1 %v750_v58 }
  0xcb   :  { %1125 = vmatpush.msrb.mxu2 %v768_v59  ;;  %1147 = vmatpush.msrb.mxu3 %v785_v60  ;;  %v1317_v59 = vld [vmem:[%s2519_s4] ss:$0 sm:$0xff] }
  0xcc   :  { %1083 = vmatpush.msrb.mxu0 %v732_v61  ;;  %1105 = vmatpush.msrb.mxu1 %v749_v62 }
  0xcd   :  { %1126 = vmatpush.msrb.mxu2 %v767_v0  ;;  %1148 = vmatpush.msrb.mxu3 %v784_v1 }
  0xce   :  { %1084 = vmatpush.msrb.mxu0 %v731_v4  ;;  %1106 = vmatpush.msrb.mxu1 %v748_v5 }
  0xcf   :  { %1127 = vmatpush.msrb.mxu2 %v766_v7  ;;  %1149 = vmatpush.msrb.mxu3 %v783_v8 }
  0xd0   :  { %1085 = vmatpush.msrb.mxu0 %v730_v10  ;;  %1107 = vmatpush.msrb.mxu1 %v747_v11 }
  0xd1   :  { %1128 = vmatpush.msrb.mxu2 %v765_v13  ;;  %1150 = vmatpush.msrb.mxu3 %v782_v15 }
  0xd2   :  { %1086 = vmatpush.msrb.mxu0 %v729_v16  ;;  %1108 = vmatpush.msrb.mxu1 %v746_v17 }
  0xd3   :  { %1129 = vmatpush.msrb.mxu2 %v764_v20  ;;  %1151 = vmatpush.msrb.mxu3 %v781_v21 }
  0xd4   :  { %1087 = vmatpush.msrb.mxu0 %v728_v23  ;;  %1109 = vmatpush.msrb.mxu1 %v745_v24 }
  0xd5   :  { %1130 = vmatpush.msrb.mxu2 %v763_v28  ;;  %1152 = vmatpush.msrb.mxu3 %v780_v30 }
  0xd6   :  { %1088 = vmatmul.f32.vlgmr.msrb.gmra.mxu0 %v516_v26  ;;  %1110 = vmatpush.msrb.mxu1 %v744_v32 }
  0xd7   :  { %1131 = vmatpush.msrb.mxu2 %v762_v35  ;;  %1153 = vmatpush.msrb.mxu3 %v779_v37 }
  0xd8   :  { %1111 = vmatmul.f32.vlgmr.msrb.gmra.mxu1 %v517_v34 }
  0xd9   :  { %1132 = vmatpush.msrb.mxu2 %v761_v39  ;;  %1154 = vmatpush.msrb.mxu3 %v778_v40 }
  0xdb   :  { %1133 = vmatpush.msrb.mxu2 %v760_v43  ;;  %1155 = vmatpush.msrb.mxu3 %v777_v44 }
  0xdc   :  { %1134 = vmatmul.f32.vlgmr.msrb.gmra.mxu2 %v518_v41 }
  0xdd   :  { %1156 = vmatpush.msrb.mxu3 %v776_v47 }
  0xde   :  { %1091 = vmatmul.f32.gmra.mxu0 %v532_v27  ;;  %1157 = vmatmul.f32.vlgmr.msrb.gmra.mxu3 %v519_v46 }
  0xe0   :  { %1114 = vmatmul.f32.gmra.mxu1 %v533_v49 }
  0xe4   :  { %1137 = vmatmul.f32.gmra.mxu2 %v534_v51 }
  0xe6   :  { %1160 = vmatmul.f32.gmra.mxu3 %v535_v52 }
 0x108   :  { %v813_v53 = vpop.f32.mrf.mxu0 }
 0x109   :  { %v814_v61 = vadd.f32 %v1317_v59, %v813_v53 }
 0x10a   :  { %v836_v54 = vpop.f32.mrf.mxu1 }
 0x10b   :  { %v837_v0 = vadd.f32 %v836_v54, %v814_v61 }
 0x110   :  { %v816_v56 = vpop.f32.mrf.mxu0 }
 0x111   :  { %v817_v3 = vadd.f32 %v1317_v59, %v816_v56 }
 0x113   :  { %v839_v58 = vpop.f32.mrf.mxu1 }
 0x114   :  { %v859_v55 = vpop.f32.mrf.mxu2  ;;  %v840_v6 = vadd.f32 %v839_v58, %v817_v3 }
 0x115   :  { %v860_v4 = vadd.f32 %v859_v55, %v837_v0 }
 0x117   :  { %v882_v57 = vpop.f32.mrf.mxu3 }
 0x118   :  { %v883_v9 = vadd.f32 %v882_v57, %v860_v4  ;;  %v1331_v57 = vld [vmem:[%s2515_s0 + $0x8] sm:$0xff] }
 0x11a   :  { %v905_v62 = vpop.f32.mrf.mxu0 }
 0x11b   :  { %v906_v12 = vadd.f32 %v905_v62, %v883_v9 }
 0x11d   :  { %v928_v1 = vpop.f32.mrf.mxu1 }
 0x11e   :  { %v862_v60 = vpop.f32.mrf.mxu2  ;;  %v929_v16 = vadd.f32 %v928_v1, %v906_v12 }
 0x11f   :  { %v863_v10 = vadd.f32 %v862_v60, %v840_v6  ;;  %v1358_v60 = vmov 32.0  }
 0x120   :  { %1320 = vrcp.f32 %v1358_v60 }
 0x121   :  { %v885_v63 = vpop.f32.mrf.mxu3 }
 0x122   :  { %v886_v13 = vadd.f32 %v885_v63, %v863_v10 }
 0x124   :  { %v908_v7 = vpop.f32.mrf.mxu0 }
 0x125   :  { %v909_v19 = vadd.f32 %v908_v7, %v886_v13 }
 0x126   :  { %v1321_v61 = vpop.eup %1320 }
 0x127   :  { %v931_v11 = vpop.f32.mrf.mxu1  ;;  %v1175_v62 = vmul.f32 32.0, %v1321_v61  ;;  %vm1179_vm1 = vweird.f32 %v1321_v61 }
 0x128   :  { %v951_v5 = vpop.f32.mrf.mxu2  ;;  %v932_v22 = vadd.f32 %v931_v11, %v909_v19 }
 0x129   :  { %v952_v20 = vadd.f32 %v951_v5, %v929_v16  ;;  %v1176_v63 = vsub.f32 1.0, %v1175_v62 }
 0x12b   :  { %v974_v8 = vpop.f32.mrf.mxu3  ;;  %v1177_v0 = vmul.f32 %v1321_v61, %v1176_v63 }
 0x12c   :  { %v975_v23 = vadd.f32 %v974_v8, %v952_v20 }
 0x12d   :  { %v1178_v1 = vadd.f32 %v1321_v61, %v1177_v0 }
 0x12f   :  { %v997_v17 = vpop.f32.mrf.mxu0  ;;  %v1180_v3 = vsel %vm1179_vm1, %v1321_v61, %v1178_v1 }
 0x130   :  { %v998_v26 = vadd.f32 %v997_v17, %v975_v23 }
 0x132   :  { %v954_v15 = vpop.f32.mrf.mxu2 }
 0x133   :  { %v1020_v21 = vpop.f32.mrf.mxu1  ;;  %v955_v28 = vadd.f32 %v954_v15, %v932_v22 }
 0x134   :  { %v1021_v32 = vadd.f32 %v1020_v21, %v998_v26 }
 0x135   :  { %v977_v18 = vpop.f32.mrf.mxu3 }
 0x136   :  { %v978_v33 = vadd.f32 %v977_v18, %v955_v28 }
 0x13e   :  { %v1043_v24 = vpop.f32.mrf.mxu2 }
 0x13f   :  { %v1044_v34 = vadd.f32 %v1043_v24, %v1021_v32 }
 0x141   :  { %v1000_v25 = vpop.f32.mrf.mxu0  ;;  %v1066_v30 = vpop.f32.mrf.mxu3 }
 0x142   :  { %v1001_v35 = vadd.f32 %v1000_v25, %v978_v33  ;;  %v1067_v29 = vadd.f32 %v1066_v30, %v1044_v34 }
 0x144   :  { %v1023_v31 = vpop.f32.mrf.mxu1 }
 0x145   :  { %v1024_v39 = vadd.f32 %v1023_v31, %v1001_v35 }
 0x147   :  { %v1046_v37 = vpop.f32.mrf.mxu2 }
 0x148   :  { %v1047_v41 = vadd.f32 %v1046_v37, %v1024_v39 }
 0x14a   :  { %v1069_v38 = vpop.f32.mrf.mxu3 }
 0x14b   :  { %v1070_v45 = vadd.f32 %v1069_v38, %v1047_v41 }
 0x153   :  { %v1089_v14 = vpop.f32.mrf.mxu0 }
 0x154   :  { %v1090_v40 = vadd.f32 %v1089_v14, %v1067_v29 }
 0x155   :  { %v1112_v36 = vpop.f32.mrf.mxu1 }
 0x156   :  { %v1113_v42 = vadd.f32 %v1112_v36, %v1090_v40 }
 0x15b   :  { %v1092_v43 = vpop.f32.mrf.mxu0 }
 0x15c   :  { %v1093_v47 = vadd.f32 %v1092_v43, %v1070_v45  ;;  %v1318_v45 = vld [vmem:[%s2520_s5] ss:$0 sm:$0xff]  ;;  %s1359_s5 = smov [#allocation2]  }
 0x15d   :  { %v1115_v49 = vpop.f32.mrf.mxu1 }
 0x15e   :  { %v1116_v51 = vadd.f32 %v1115_v49, %v1093_v47 }
 0x15f   :  { %v1135_v44 = vpop.f32.mrf.mxu2 }
 0x160   :  { %v1136_v27 = vadd.f32 %v1135_v44, %v1113_v42 }
 0x161   :  { %v1158_v46 = vpop.f32.mrf.mxu3 }
 0x162   :  { %v1159_v48 = vadd.f32 %v1158_v46, %v1136_v27 }
 0x164   :  { %v1164_v50 = vadd.f32 %v1330_v2, %v1159_v48 }
 0x166   :  { %v1168_v52 = vsel %vm129_vm0, %v1164_v50, 0.0 }
 0x167   :  { %v1138_v53 = vpop.f32.mrf.mxu2  ;;  %1169 = vadd.xlane.f32.xlu0 %v1168_v52  ;;  %v1319_v52 = vld [vmem:[%s2521_s6] ss:$0 sm:$0xff]  ;;  %s1267_s6 = sshll.u32 %s1359_s5, 4  ;;  %s1268_s6 = int_to_ptr.vmem [resolvable:$true] %s1267_s6 }
 0x168   :  { %v1139_v54 = vadd.f32 %v1138_v53, %v1116_v51 }
 0x169   :  { %v1161_v55 = vpop.f32.mrf.mxu3 }
 0x16a   :  { %v1162_v56 = vadd.f32 %v1161_v55, %v1139_v54 }
 0x16c   :  { %v1165_v58 = vadd.f32 %v1331_v57, %v1162_v56 }
 0x16e   :  { %v1171_v59 = vsel %vm129_vm0, %v1165_v58, 0.0 }
 0x16f   :  { %1172 = vadd.xlane.f32.xlu0 %v1171_v59 }
 0x1da   :  { %v1170_v4 = vpop.xlane.xlu0 %1169 }
 0x1db   :  { %v1181_v5 = vmul.f32 %v1180_v3, %v1170_v4 }
 0x1dd   :  { %v1183_v6 = vsub.f32 %v1164_v50, %v1181_v5 }
 0x1df   :  { %v1185_v7 = vmul.f32 %v1183_v6, %v1183_v6  ;;  %v1222_v2 = vmul.f32 %v1318_v45, %v1183_v6 }
 0x1e1   :  { %v1187_v8 = vsel %vm129_vm0, %v1185_v7, 0.0 }
 0x1e2   :  { %1188 = vadd.xlane.f32.xlu1 %v1187_v8  ;;  %v1173_v9 = vpop.xlane.xlu0 %1172 }
 0x1e3   :  { %v1182_v10 = vmul.f32 %v1180_v3, %v1173_v9 }
 0x1e5   :  { %v2498_v11 = vsub.f32 %v1165_v58, %v1182_v10 }
 0x1e7   :  { %v1186_v12 = vmul.f32 %v2498_v11, %v2498_v11  ;;  %v1223_v62 = vmul.f32 %v1318_v45, %v2498_v11 }
 0x1e9   :  { %v1190_v13 = vsel %vm129_vm0, %v1186_v12, 0.0 }
 0x1ea   :  { %1191 = vadd.xlane.f32.xlu1 %v1190_v13 }
 0x255   :  { %v1189_v15 = vpop.xlane.xlu1 %1188 }
 0x256   :  { %v1193_v16 = vmul.f32 0.032258064, %v1189_v15 }
 0x258   :  { %1322 = vrsqrt.f32 %v1193_v16  ;;  %vm1202_vm2 = vcmp.eq.f32.partialorder %v1193_v16, inf  ;;  %v1205_v31 = vand.u32 2147483648, %v1193_v16  ;;  %vm1204_vm3 = vcmp.eq.f32.partialorder %v1193_v16, 0.0 }
 0x25d   :  { %v1192_v17 = vpop.xlane.xlu1 %1191 }
 0x25e   :  { %v1323_v18 = vpop.eup %1322  ;;  %v1194_v19 = vmul.f32 0.032258064, %v1192_v17 }
 0x25f   :  { %v1196_v20 = vmul.f32 %v1323_v18, %v1193_v16 }
 0x260   :  { %1324 = vrsqrt.f32 %v1194_v19  ;;  %vm1214_vm4 = vcmp.eq.f32.partialorder %v1194_v19, inf  ;;  %v1217_v38 = vand.u32 2147483648, %v1194_v19  ;;  %vm1216_vm5 = vcmp.eq.f32.partialorder %v1194_v19, 0.0 }
 0x261   :  { %v1197_v21 = vmul.f32 %v1323_v18, %v1196_v20 }
 0x263   :  { %v1198_v22 = vmul.f32 0.5, %v1197_v21 }
 0x265   :  { %v1199_v23 = vsub.f32 1.5, %v1198_v22 }
 0x266   :  { %v1325_v24 = vpop.eup %1324 }
 0x267   :  { %v1200_v25 = vmul.f32 %v1323_v18, %v1199_v23  ;;  %v1208_v26 = vmul.f32 %v1325_v24, %v1194_v19 }
 0x269   :  { %v1201_v28 = vmul.f32 %v1200_v25, %v1193_v16  ;;  %v1209_v30 = vmul.f32 %v1325_v24, %v1208_v26 }
 0x26b   :  { %v1203_v32 = vsel %vm1202_vm2, %v1193_v16, %v1201_v28  ;;  %v1210_v33 = vmul.f32 0.5, %v1209_v30 }
 0x26c   :  { %v1206_v34 = vsel %vm1204_vm3, %v1205_v31, %v1203_v32 }
 0x26d   :  { %v1224_v14 = vadd.f32 1e-06, %v1206_v34  ;;  %v1211_v35 = vsub.f32 1.5, %v1210_v33 }
 0x26f   :  { %1326 = vrcp.f32 %v1224_v14  ;;  %v1212_v37 = vmul.f32 %v1325_v24, %v1211_v35  ;;  %v1237_v44 = vand.u32 2147483648, %v1224_v14  ;;  %v1235_v46 = vand.u32 2147483647, %v1224_v14 }
 0x270   :  { %vm1231_vm7 = vweird.f32 %v1224_v14 }
 0x271   :  { %v1213_v29 = vmul.f32 %v1212_v37, %v1194_v19  ;;  %v1238_v49 = vor.u32 1.1754944e-38, %v1237_v44  ;;  %vm1236_vm9 = vcmp.eq.f32.partialorder %v1235_v46, 8.507059e+37 }
 0x273   :  { %v1215_v36 = vsel %vm1214_vm4, %v1194_v19, %v1213_v29 }
 0x274   :  { %v1218_v39 = vsel %vm1216_vm5, %v1217_v38, %v1215_v36 }
 0x275   :  { %v1327_v40 = vpop.eup %1326  ;;  %v1225_v41 = vadd.f32 1e-06, %v1218_v39 }
 0x276   :  { %v1227_v42 = vmul.f32 %v1327_v40, %v1224_v14  ;;  %vm1232_vm6 = vweird.f32 %v1327_v40 }
 0x277   :  { %1328 = vrcp.f32 %v1225_v41  ;;  %vm1233_vm8 = vmor %vm1231_vm7, %vm1232_vm6  ;;  %v1252_v56 = vand.u32 2147483648, %v1225_v41  ;;  %v1250_v58 = vand.u32 2147483647, %v1225_v41  ;;  %vm1246_vm11 = vweird.f32 %v1225_v41 }
 0x278   :  { %v1228_v43 = vsub.f32 1.0, %v1227_v42 }
 0x279   :  { %v1253_v61 = vor.u32 1.1754944e-38, %v1252_v56  ;;  %vm1251_vm13 = vcmp.eq.f32.partialorder %v1250_v58, 8.507059e+37 }
 0x27a   :  { %v1229_v27 = vmul.f32 %v1327_v40, %v1228_v43 }
 0x27c   :  { %v1230_v47 = vadd.f32 %v1327_v40, %v1229_v27 }
 0x27d   :  { %v1329_v48 = vpop.eup %1328 }
 0x27e   :  { %v1234_v50 = vsel %vm1233_vm8, %v1327_v40, %v1230_v47  ;;  %v1242_v51 = vmul.f32 %v1329_v48, %v1225_v41  ;;  %vm1247_vm10 = vweird.f32 %v1329_v48 }
 0x27f   :  { %v1239_v53 = vsel %vm1236_vm9, %v1238_v49, %v1234_v50  ;;  %vm1248_vm12 = vmor %vm1246_vm11, %vm1247_vm10 }
 0x280   :  { %v1240_v54 = vmul.f32 %v1239_v53, %v1222_v2  ;;  %v1243_v55 = vsub.f32 1.0, %v1242_v51 }
 0x282   :  { %v1244_v57 = vmul.f32 %v1329_v48, %v1243_v55  ;;  %v1259_v59 = vadd.f32 %v1319_v52, %v1240_v54 }
 0x284   :  { %v1245_v60 = vadd.f32 %v1329_v48, %v1244_v57  ;;  %1261 = vst.msk [vmem:[#allocation2] sm:$0xff] %vm129_vm0, %v1259_v59 }
 0x286   :  { %v1249_v63 = vsel %vm1248_vm12, %v1329_v48, %v1245_v60 }
 0x287   :  { %v1254_v0 = vsel %vm1251_vm13, %v1253_v61, %v1249_v63 }
 0x288   :  { %v1255_v1 = vmul.f32 %v1254_v0, %v1223_v62 }
 0x28a   :  { %v1260_v3 = vadd.f32 %v1319_v52, %v1255_v1 }
 0x28c   :  { %1262 = vst.msk [vmem:[#allocation2 + $0x8] sm:$0xff] %vm129_vm0, %v1260_v3 }
 0x28d   :  { %1275 = dma.vmem_to_hbm [thread:$0]  %s1268_s6, 256, %s1270_s30, [#allocation3], %s1360_s8, %s1360_s8, %s1361_s9  }
 0x28e   :  { %1356 = dma.done.wait [#allocation3], 256  }
 0x28f   :  { %1357 = vsyncadd [#allocation3], 4294967040 }
 0x290   :  { %1280 = vsyncpa [#allocation3], 1 }

</bundles_post_ra>
